<compile_context>
chip_gen: v5e
topology: v5e:2x2
jax: 0.10.0
libtpu: 0.0.40
codegen_flags: <defaults>
</compile_context>

<pallas_src>
import functools

import jax
import jax.numpy as jnp
import numpy as np
from jax.experimental import pallas as pl
from jax.experimental.pallas import tpu as pltpu


def _tap_masks(h, w, n):
    """(9, 1, n*h*w) f32 validity masks for the 9 taps of a 3x3 / pad=1 conv.

    Built once on the host and tiled over the n images folded onto the lane axis, so
    both image-edge wrap and cross-image wrap introduced by pltpu.roll are zeroed.
    """
    idx = np.arange(h * w)
    row, col = idx // w, idx % w
    masks = np.empty((9, 1, h * w), np.float32)
    for k in range(9):
        oi, oj = k // 3 - 1, k % 3 - 1
        valid = ((row + oi >= 0) & (row + oi < h) &
                 (col + oj >= 0) & (col + oj < w))
        masks[k, 0] = valid.astype(np.float32)
    return jnp.asarray(np.tile(masks, (1, 1, n)))


def _decimation_matrix(n, h, w, s):
    """(n*h*w, n*ho*wo) 0/1 selection matrix mapping a dense stride-1 conv output to
    the stride-s output (per image, rows/cols 0, s, 2s, ...)."""
    ho, wo = (h - 1) // s + 1, (w - 1) // s + 1
    d = np.zeros((n * h * w, n * ho * wo), np.float32)
    for i in range(n):
        for r in range(ho):
            for c in range(wo):
                d[i * h * w + (r * s) * w + c * s, i * ho * wo + r * wo + c] = 1.0
    return jnp.asarray(d)


# ----------------------------- Pallas kernel --------------------------------
def basic_block_kernel(*refs, W, Wo, stride, shortcut_conv, eps):
    refs = list(refs)
    x_ref = refs.pop(0)                                    # (Cin, N*H*W) f32
    ma_ref = refs.pop(0)                                   # (9, 1, N*H*W) conv1 masks
    if stride == 1:
        mb_ref = ma_ref                                    # conv2 at same resolution
        dec_ref = xsc_ref = None
    else:
        mb_ref = refs.pop(0)                               # (9, 1, N*Ho*Wo)
        dec_ref = refs.pop(0)                              # (N*H*W, N*Ho*Wo) 0/1
        xsc_ref = refs.pop(0)                              # (Cin, N*Ho*Wo) f32
    w1_ref, g1_ref, b1_ref = refs.pop(0), refs.pop(0), refs.pop(0)
    w2_ref, g2_ref, b2_ref = refs.pop(0), refs.pop(0), refs.pop(0)
    if shortcut_conv:
        wsc_ref, gsc_ref, bsc_ref = refs.pop(0), refs.pop(0), refs.pop(0)
    out_ref = refs.pop(0)
    mm_dtype = w1_ref.dtype                                # bf16 (or f32) matmul operands

    def conv3x3(inp, w_ref, m_ref, row_len):
        # inp: (C, L) f32, L = flattened (image, row, col) on the lane axis.
        # Stack the 9 rolled+masked taps into ONE (9*C, L) operand -> ONE MXU matmul.
        L = inp.shape[1]
        taps = []
        for k in range(9):
            oi, oj = k // 3 - 1, k % 3 - 1
            off = oi * row_len + oj
            t = inp if off == 0 else pltpu.roll(inp, (-off) % L, 1)
            taps.append((t * m_ref[k]).astype(mm_dtype))   # mask kills wrapped lanes
        stacked = jnp.concatenate(taps, axis=0)            # (9*C, L)
        return jnp.dot(w_ref[...], stacked, preferred_element_type=jnp.float32)

    def bn(y, g_ref, b_ref):
        # Training-mode BatchNorm (batch mean, biased variance); two-pass for numerics.
        mean = jnp.mean(y, axis=1, keepdims=True)          # (C, 1)
        cen = y - mean
        var = jnp.mean(cen * cen, axis=1, keepdims=True)
        scale = g_ref[...] * jax.lax.rsqrt(var + eps)
        return cen * scale + b_ref[...]

    x = x_ref[...].astype(jnp.float32)                     # (Cin, N*H*W)

    # conv1 (3x3, stride) -> BN1 -> ReLU
    h = conv3x3(x, w1_ref, ma_ref, W)                      # (P, N*H*W) f32
    if stride != 1:
        # TODO(synk): dense-then-decimate (0/1 selection matmul keeps stores lane-dense
        # and avoids lane-strided slices); replace with direct strided-tap evaluation
        # at real ResNet sizes.
        h = jnp.dot(h.astype(mm_dtype), dec_ref[...],
                    preferred_element_type=jnp.float32)    # (P, N*Ho*Wo)
    h = jnp.maximum(bn(h, g1_ref, b1_ref), 0.0)

    # conv2 (3x3, stride 1) -> BN2
    h = bn(conv3x3(h, w2_ref, mb_ref, Wo), g2_ref, b2_ref)

    # shortcut
    if shortcut_conv:
        xs = x if stride == 1 else xsc_ref[...].astype(jnp.float32)
        sc = bn(jnp.dot(wsc_ref[...], xs.astype(mm_dtype),
                        preferred_element_type=jnp.float32),
                gsc_ref, bsc_ref)
    else:
        sc = x                                             # identity: Cin == planes

    out_ref[...] = jnp.maximum(h + sc, 0.0).astype(out_ref.dtype)


# ------------------------------ wrapper --------------------------------------
def basic_block(x_nchw, params, *, stride=1, eps=1e-5, matmul_dtype=jnp.bfloat16):
    """BasicBlock forward. x: (N, Cin, H, W) f32 -> (N, planes, Ho, Wo) f32."""
    N, Cin, H, W = x_nchw.shape
    P = params["w1"].shape[0]                              # planes
    shortcut_conv = (stride != 1) or (Cin != P)
    Ho, Wo = (H - 1) // stride + 1, (W - 1) // stride + 1
    L1, L2 = N * H * W, N * Ho * Wo
    f32 = jnp.float32

    # Layout plumbing (free, outside the kernel): fold batch onto the lane axis.
    def to_cl(a, h, w):                                    # (N, C, h, w) -> (C, N*h*w)
        c = a.shape[1]
        return jnp.transpose(a.reshape(N, c, h * w), (1, 0, 2)).reshape(c, N * h * w)

    # torch (P, C, 3, 3) -> (P, 9*C); column k*C + c holds w[p, c, k//3, k%3], matching
    # the order of the stacked-tap operand built in the kernel.
    def wconv(w):
        p, c = w.shape[0], w.shape[1]
        return jnp.transpose(w, (0, 2, 3, 1)).reshape(p, 9 * c).astype(matmul_dtype)

    bnp = lambda a: a.reshape(-1, 1).astype(f32)

    args = [to_cl(x_nchw, H, W).astype(f32), _tap_masks(H, W, N)]
    if stride != 1:
        args += [_tap_masks(Ho, Wo, N),
                 _decimation_matrix(N, H, W, stride).astype(matmul_dtype),
                 to_cl(x_nchw[:, :, ::stride, ::stride], Ho, Wo).astype(f32)]
    args += [wconv(params["w1"]), bnp(params["g1"]), bnp(params["b1"]),
             wconv(params["w2"]), bnp(params["g2"]), bnp(params["b2"])]
    if shortcut_conv:
        args += [params["wsc"].reshape(P, Cin).astype(matmul_dtype),
                 bnp(params["gsc"]), bnp(params["bsc"])]

    flops = (2 * P * 9 * Cin * L1 + 2 * P * 9 * P * L2
             + (2 * P * L1 * L2 if stride != 1 else 0)
             + (2 * P * Cin * L2 if shortcut_conv else 0)
             + 9 * Cin * L1 + 9 * P * L2 + 14 * P * L2)
    bytes_accessed = int(sum(int(np.prod(a.shape)) * a.dtype.itemsize for a in args)
                         + P * L2 * x_nchw.dtype.itemsize)

    vmem = pl.BlockSpec(memory_space=pltpu.MemorySpace.VMEM)
    kernel = functools.partial(basic_block_kernel, W=W, Wo=Wo, stride=stride,
                               shortcut_conv=shortcut_conv, eps=eps)
    # TODO(synk): at real ResNet sizes add a grid over batch/spatial row tiles
    # ("parallel" dims for megacore / v7x's two TensorCores, weights/masks with
    # constant index_maps) with accumulate-then-finalize BN stats across an
    # "arbitrary" axis; at these toy shapes everything is VMEM-resident, so a single
    # fused program avoids per-grid-step overhead.
    out = pl.pallas_call(
        kernel,
        out_shape=jax.ShapeDtypeStruct((P, L2), x_nchw.dtype),
        in_specs=[vmem] * len(args),
        out_specs=vmem,
        compiler_params=pltpu.CompilerParams(vmem_limit_bytes=32 * 1024 * 1024),
        cost_estimate=pl.CostEstimate(
            flops=int(flops),
            transcendentals=(3 if shortcut_conv else 2) * P,
            bytes_accessed=bytes_accessed),
    )(*args)

    # (P, N*Ho*Wo) lane-dense kernel output -> NCHW for the caller.
    return jnp.transpose(out.reshape(P, N, Ho, Wo), (1, 0, 2, 3))


# --------------------------- pure-JAX reference -------------------------------
def reference_basic_block(x, params, *, stride=1, eps=1e-5):
    def bn(y, g, b):
        mean = jnp.mean(y, axis=(0, 2, 3), keepdims=True)
        var = jnp.mean((y - mean) ** 2, axis=(0, 2, 3), keepdims=True)
        return ((y - mean) * jax.lax.rsqrt(var + eps) * g.reshape(1, -1, 1, 1)
                + b.reshape(1, -1, 1, 1))

    def conv(v, w, s, pad):
        return jax.lax.conv_general_dilated(
            v, w, (s, s), ((pad, pad), (pad, pad)),
            dimension_numbers=("NCHW", "OIHW", "NCHW"),
            precision=jax.lax.Precision.HIGHEST)

    Cin, P = x.shape[1], params["w1"].shape[0]
    h = jax.nn.relu(bn(conv(x, params["w1"], stride, 1), params["g1"], params["b1"]))
    h = bn(conv(h, params["w2"], 1, 1), params["g2"], params["b2"])
    if stride != 1 or Cin != P:
        sc = bn(conv(x, params["wsc"], stride, 0), params["gsc"], params["bsc"])
    else:
        sc = x
    return jax.nn.relu(h + sc)


# ------------------------------- main -----------------------------------------
if __name__ == "__main__":
    def make_params(key, cin, p):
        f32 = jnp.float32
        ks = jax.random.split(key, 9)
        return {
            "w1": jax.random.normal(ks[0], (p, cin, 3, 3), f32) / np.sqrt(9 * cin),
            "g1": 1.0 + 0.1 * jax.random.normal(ks[1], (p,), f32),
            "b1": 0.1 * jax.random.normal(ks[2], (p,), f32),
            "w2": jax.random.normal(ks[3], (p, p, 3, 3), f32) / np.sqrt(9 * p),
            "g2": 1.0 + 0.1 * jax.random.normal(ks[4], (p,), f32),
            "b2": 0.1 * jax.random.normal(ks[5], (p,), f32),
            "wsc": jax.random.normal(ks[6], (p, cin, 1, 1), f32) / np.sqrt(cin),
            "gsc": 1.0 + 0.1 * jax.random.normal(ks[7], (p,), f32),
            "bsc": 0.1 * jax.random.normal(ks[8], (p,), f32),
        }

    root = jax.random.PRNGKey(0)
    configs = [
        # (N, Cin, H, W, planes, stride)
        (2, 4, 16, 16, 8, 1),   # projection shortcut (Cin != planes)
        (2, 8, 16, 16, 8, 1),   # identity shortcut
        (2, 4, 16, 16, 8, 2),   # projection shortcut + stride 2
    ]

    # Fast path: bf16 matmul operands / f32 accumulation (tolerance sized for bf16).
    for idx, (N, Cin, H, W, P, stride) in enumerate(configs):
        kp, kx = jax.random.split(jax.random.fold_in(root, idx))
        params = make_params(kp, Cin, P)
        x = jax.random.normal(kx, (N, Cin, H, W), jnp.float32)
        Ho, Wo = (H - 1) // stride + 1, (W - 1) // stride + 1

        out = jax.block_until_ready(basic_block(x, params, stride=stride))
        ref = jax.block_until_ready(reference_basic_block(x, params, stride=stride))
        assert out.shape == (N, P, Ho, Wo), out.shape
        np.testing.assert_allclose(np.asarray(out), np.asarray(ref),
                                   rtol=3e-2, atol=3e-2)

    # Tight-tolerance structural check with f32 matmul operands (config 0).
    N, Cin, H, W, P, stride = configs[0]
    kp, kx = jax.random.split(jax.random.fold_in(root, 0))
    params = make_params(kp, Cin, P)
    x = jax.random.normal(kx, (N, Cin, H, W), jnp.float32)
    out = jax.block_until_ready(
        basic_block(x, params, stride=stride, matmul_dtype=jnp.float32))
    ref = jax.block_until_ready(reference_basic_block(x, params, stride=stride))
    np.testing.assert_allclose(np.asarray(out), np.asarray(ref), rtol=5e-3, atol=5e-3)

    print("KERNEL_OK")
</pallas_src>

<mosaic_0001>
module attributes {stable_mosaic.version = 11 : i64} {
  func.func @basic_block_kernel(%arg0: memref<4x512xf32, #tpu.memory_space<vmem>>, %arg1: memref<9x1x512xf32, #tpu.memory_space<vmem>>, %arg2: memref<8x36xbf16, #tpu.memory_space<vmem>>, %arg3: memref<8x1xf32, #tpu.memory_space<vmem>>, %arg4: memref<8x1xf32, #tpu.memory_space<vmem>>, %arg5: memref<8x72xbf16, #tpu.memory_space<vmem>>, %arg6: memref<8x1xf32, #tpu.memory_space<vmem>>, %arg7: memref<8x1xf32, #tpu.memory_space<vmem>>, %arg8: memref<8x4xbf16, #tpu.memory_space<vmem>>, %arg9: memref<8x1xf32, #tpu.memory_space<vmem>>, %arg10: memref<8x1xf32, #tpu.memory_space<vmem>>, %arg11: memref<8x512xf32, #tpu.memory_space<vmem>>) attributes {dimension_semantics = [], scalar_prefetch = 0 : i64, scratch_operands = 0 : i64, tpu.core_type = #tpu.core_type<tc>} {
    %c0 = arith.constant 0 : index
    %c0_0 = arith.constant 0 : index
    %0 = vector.load %arg0[%c0, %c0_0] : memref<4x512xf32, #tpu.memory_space<vmem>>, vector<4x512xf32>
    %c17_i32 = arith.constant 17 : i32
    %1 = tpu.dynamic_rotate %0 by %c17_i32 dim 1 : vector<4x512xf32>, i32 -> vector<4x512xf32>
    %c0_1 = arith.constant 0 : index
    %c0_2 = arith.constant 0 : index
    %c0_3 = arith.constant 0 : index
    %2 = vector.load %arg1[%c0_1, %c0_2, %c0_3] : memref<9x1x512xf32, #tpu.memory_space<vmem>>, vector<1x1x512xf32>
    %3 = vector.shape_cast %2 : vector<1x1x512xf32> to vector<1x512xf32>
    %4 = vector.broadcast %3 : vector<1x512xf32> to vector<4x512xf32>
    %5 = arith.mulf %1, %4 : vector<4x512xf32>
    %6 = arith.truncf %5 : vector<4x512xf32> to vector<4x512xbf16>
    %c16_i32 = arith.constant 16 : i32
    %7 = tpu.dynamic_rotate %0 by %c16_i32 dim 1 : vector<4x512xf32>, i32 -> vector<4x512xf32>
    %c1 = arith.constant 1 : index
    %c0_4 = arith.constant 0 : index
    %c0_5 = arith.constant 0 : index
    %8 = vector.load %arg1[%c1, %c0_4, %c0_5] : memref<9x1x512xf32, #tpu.memory_space<vmem>>, vector<1x1x512xf32>
    %9 = vector.shape_cast %8 : vector<1x1x512xf32> to vector<1x512xf32>
    %10 = vector.broadcast %9 : vector<1x512xf32> to vector<4x512xf32>
    %11 = arith.mulf %7, %10 : vector<4x512xf32>
    %12 = arith.truncf %11 : vector<4x512xf32> to vector<4x512xbf16>
    %c15_i32 = arith.constant 15 : i32
    %13 = tpu.dynamic_rotate %0 by %c15_i32 dim 1 : vector<4x512xf32>, i32 -> vector<4x512xf32>
    %c2 = arith.constant 2 : index
    %c0_6 = arith.constant 0 : index
    %c0_7 = arith.constant 0 : index
    %14 = vector.load %arg1[%c2, %c0_6, %c0_7] : memref<9x1x512xf32, #tpu.memory_space<vmem>>, vector<1x1x512xf32>
    %15 = vector.shape_cast %14 : vector<1x1x512xf32> to vector<1x512xf32>
    %16 = vector.broadcast %15 : vector<1x512xf32> to vector<4x512xf32>
    %17 = arith.mulf %13, %16 : vector<4x512xf32>
    %18 = arith.truncf %17 : vector<4x512xf32> to vector<4x512xbf16>
    %c1_i32 = arith.constant 1 : i32
    %19 = tpu.dynamic_rotate %0 by %c1_i32 dim 1 : vector<4x512xf32>, i32 -> vector<4x512xf32>
    %c3 = arith.constant 3 : index
    %c0_8 = arith.constant 0 : index
    %c0_9 = arith.constant 0 : index
    %20 = vector.load %arg1[%c3, %c0_8, %c0_9] : memref<9x1x512xf32, #tpu.memory_space<vmem>>, vector<1x1x512xf32>
    %21 = vector.shape_cast %20 : vector<1x1x512xf32> to vector<1x512xf32>
    %22 = vector.broadcast %21 : vector<1x512xf32> to vector<4x512xf32>
    %23 = arith.mulf %19, %22 : vector<4x512xf32>
    %24 = arith.truncf %23 : vector<4x512xf32> to vector<4x512xbf16>
    %c4 = arith.constant 4 : index
    %c0_10 = arith.constant 0 : index
    %c0_11 = arith.constant 0 : index
    %25 = vector.load %arg1[%c4, %c0_10, %c0_11] : memref<9x1x512xf32, #tpu.memory_space<vmem>>, vector<1x1x512xf32>
    %26 = vector.shape_cast %25 : vector<1x1x512xf32> to vector<1x512xf32>
    %27 = vector.broadcast %26 : vector<1x512xf32> to vector<4x512xf32>
    %28 = arith.mulf %0, %27 : vector<4x512xf32>
    %29 = arith.truncf %28 : vector<4x512xf32> to vector<4x512xbf16>
    %c511_i32 = arith.constant 511 : i32
    %30 = tpu.dynamic_rotate %0 by %c511_i32 dim 1 : vector<4x512xf32>, i32 -> vector<4x512xf32>
    %c5 = arith.constant 5 : index
    %c0_12 = arith.constant 0 : index
    %c0_13 = arith.constant 0 : index
    %31 = vector.load %arg1[%c5, %c0_12, %c0_13] : memref<9x1x512xf32, #tpu.memory_space<vmem>>, vector<1x1x512xf32>
    %32 = vector.shape_cast %31 : vector<1x1x512xf32> to vector<1x512xf32>
    %33 = vector.broadcast %32 : vector<1x512xf32> to vector<4x512xf32>
    %34 = arith.mulf %30, %33 : vector<4x512xf32>
    %35 = arith.truncf %34 : vector<4x512xf32> to vector<4x512xbf16>
    %c497_i32 = arith.constant 497 : i32
    %36 = tpu.dynamic_rotate %0 by %c497_i32 dim 1 : vector<4x512xf32>, i32 -> vector<4x512xf32>
    %c6 = arith.constant 6 : index
    %c0_14 = arith.constant 0 : index
    %c0_15 = arith.constant 0 : index
    %37 = vector.load %arg1[%c6, %c0_14, %c0_15] : memref<9x1x512xf32, #tpu.memory_space<vmem>>, vector<1x1x512xf32>
    %38 = vector.shape_cast %37 : vector<1x1x512xf32> to vector<1x512xf32>
    %39 = vector.broadcast %38 : vector<1x512xf32> to vector<4x512xf32>
    %40 = arith.mulf %36, %39 : vector<4x512xf32>
    %41 = arith.truncf %40 : vector<4x512xf32> to vector<4x512xbf16>
    %c496_i32 = arith.constant 496 : i32
    %42 = tpu.dynamic_rotate %0 by %c496_i32 dim 1 : vector<4x512xf32>, i32 -> vector<4x512xf32>
    %c7 = arith.constant 7 : index
    %c0_16 = arith.constant 0 : index
    %c0_17 = arith.constant 0 : index
    %43 = vector.load %arg1[%c7, %c0_16, %c0_17] : memref<9x1x512xf32, #tpu.memory_space<vmem>>, vector<1x1x512xf32>
    %44 = vector.shape_cast %43 : vector<1x1x512xf32> to vector<1x512xf32>
    %45 = vector.broadcast %44 : vector<1x512xf32> to vector<4x512xf32>
    %46 = arith.mulf %42, %45 : vector<4x512xf32>
    %47 = arith.truncf %46 : vector<4x512xf32> to vector<4x512xbf16>
    %c495_i32 = arith.constant 495 : i32
    %48 = tpu.dynamic_rotate %0 by %c495_i32 dim 1 : vector<4x512xf32>, i32 -> vector<4x512xf32>
    %c8 = arith.constant 8 : index
    %c0_18 = arith.constant 0 : index
    %c0_19 = arith.constant 0 : index
    %49 = vector.load %arg1[%c8, %c0_18, %c0_19] : memref<9x1x512xf32, #tpu.memory_space<vmem>>, vector<1x1x512xf32>
    %50 = vector.shape_cast %49 : vector<1x1x512xf32> to vector<1x512xf32>
    %51 = vector.broadcast %50 : vector<1x512xf32> to vector<4x512xf32>
    %52 = arith.mulf %48, %51 : vector<4x512xf32>
    %53 = arith.truncf %52 : vector<4x512xf32> to vector<4x512xbf16>
    %54 = tpu.concatenate %6, %12, %18, %24, %29, %35, %41, %47, %53 in 0 : vector<4x512xbf16>, vector<4x512xbf16>, vector<4x512xbf16>, vector<4x512xbf16>, vector<4x512xbf16>, vector<4x512xbf16>, vector<4x512xbf16>, vector<4x512xbf16>, vector<4x512xbf16> -> vector<36x512xbf16>
    %c0_20 = arith.constant 0 : index
    %c0_21 = arith.constant 0 : index
    %55 = vector.load %arg2[%c0_20, %c0_21] : memref<8x36xbf16, #tpu.memory_space<vmem>>, vector<8x36xbf16>
    %cst = arith.constant dense<0.000000e+00> : vector<8x512xf32>
    %56 = tpu.matmul %55, %54, %cst {dimension_numbers = #tpu.dot_dimension_numbers<[1], [0], [0], [1], [0, 0, 1, 1], [], []>} : vector<8x36xbf16>, vector<36x512xbf16>, vector<8x512xf32> -> vector<8x512xf32>
    %cst_22 = arith.constant dense<0.000000e+00> : vector<8xf32>
    %57 = vector.multi_reduction <add>, %56, %cst_22 [1] : vector<8x512xf32> to vector<8xf32>
    %58 = vector.shape_cast %57 : vector<8xf32> to vector<8x1xf32>
    %cst_23 = arith.constant 5.120000e+02 : f32
    %59 = vector.broadcast %cst_23 : f32 to vector<8x1xf32>
    %60 = arith.divf %58, %59 : vector<8x1xf32>
    %61 = vector.broadcast %60 : vector<8x1xf32> to vector<8x512xf32>
    %62 = arith.subf %56, %61 : vector<8x512xf32>
    %63 = arith.mulf %62, %62 : vector<8x512xf32>
    %cst_24 = arith.constant dense<0.000000e+00> : vector<8xf32>
    %64 = vector.multi_reduction <add>, %63, %cst_24 [1] : vector<8x512xf32> to vector<8xf32>
    %65 = vector.shape_cast %64 : vector<8xf32> to vector<8x1xf32>
    %cst_25 = arith.constant 5.120000e+02 : f32
    %66 = vector.broadcast %cst_25 : f32 to vector<8x1xf32>
    %67 = arith.divf %65, %66 : vector<8x1xf32>
    %c0_26 = arith.constant 0 : index
    %c0_27 = arith.constant 0 : index
    %68 = vector.load %arg3[%c0_26, %c0_27] : memref<8x1xf32, #tpu.memory_space<vmem>>, vector<8x1xf32>
    %cst_28 = arith.constant 9.99999974E-6 : f32
    %69 = vector.broadcast %cst_28 : f32 to vector<8x1xf32>
    %70 = arith.addf %67, %69 : vector<8x1xf32>
    %71 = math.rsqrt %70 : vector<8x1xf32>
    %72 = arith.mulf %68, %71 : vector<8x1xf32>
    %73 = vector.broadcast %72 : vector<8x1xf32> to vector<8x512xf32>
    %74 = arith.mulf %62, %73 : vector<8x512xf32>
    %c0_29 = arith.constant 0 : index
    %c0_30 = arith.constant 0 : index
    %75 = vector.load %arg4[%c0_29, %c0_30] : memref<8x1xf32, #tpu.memory_space<vmem>>, vector<8x1xf32>
    %76 = vector.broadcast %75 : vector<8x1xf32> to vector<8x512xf32>
    %77 = arith.addf %74, %76 : vector<8x512xf32>
    %cst_31 = arith.constant 0.000000e+00 : f32
    %78 = vector.broadcast %cst_31 : f32 to vector<8x512xf32>
    %79 = arith.maximumf %77, %78 : vector<8x512xf32>
    %c17_i32_32 = arith.constant 17 : i32
    %80 = tpu.dynamic_rotate %79 by %c17_i32_32 dim 1 : vector<8x512xf32>, i32 -> vector<8x512xf32>
    %c0_33 = arith.constant 0 : index
    %c0_34 = arith.constant 0 : index
    %c0_35 = arith.constant 0 : index
    %81 = vector.load %arg1[%c0_33, %c0_34, %c0_35] : memref<9x1x512xf32, #tpu.memory_space<vmem>>, vector<1x1x512xf32>
    %82 = vector.shape_cast %81 : vector<1x1x512xf32> to vector<1x512xf32>
    %83 = vector.broadcast %82 : vector<1x512xf32> to vector<8x512xf32>
    %84 = arith.mulf %80, %83 : vector<8x512xf32>
    %85 = arith.truncf %84 : vector<8x512xf32> to vector<8x512xbf16>
    %c16_i32_36 = arith.constant 16 : i32
    %86 = tpu.dynamic_rotate %79 by %c16_i32_36 dim 1 : vector<8x512xf32>, i32 -> vector<8x512xf32>
    %c1_37 = arith.constant 1 : index
    %c0_38 = arith.constant 0 : index
    %c0_39 = arith.constant 0 : index
    %87 = vector.load %arg1[%c1_37, %c0_38, %c0_39] : memref<9x1x512xf32, #tpu.memory_space<vmem>>, vector<1x1x512xf32>
    %88 = vector.shape_cast %87 : vector<1x1x512xf32> to vector<1x512xf32>
    %89 = vector.broadcast %88 : vector<1x512xf32> to vector<8x512xf32>
    %90 = arith.mulf %86, %89 : vector<8x512xf32>
    %91 = arith.truncf %90 : vector<8x512xf32> to vector<8x512xbf16>
    %c15_i32_40 = arith.constant 15 : i32
    %92 = tpu.dynamic_rotate %79 by %c15_i32_40 dim 1 : vector<8x512xf32>, i32 -> vector<8x512xf32>
    %c2_41 = arith.constant 2 : index
    %c0_42 = arith.constant 0 : index
    %c0_43 = arith.constant 0 : index
    %93 = vector.load %arg1[%c2_41, %c0_42, %c0_43] : memref<9x1x512xf32, #tpu.memory_space<vmem>>, vector<1x1x512xf32>
    %94 = vector.shape_cast %93 : vector<1x1x512xf32> to vector<1x512xf32>
    %95 = vector.broadcast %94 : vector<1x512xf32> to vector<8x512xf32>
    %96 = arith.mulf %92, %95 : vector<8x512xf32>
    %97 = arith.truncf %96 : vector<8x512xf32> to vector<8x512xbf16>
    %c1_i32_44 = arith.constant 1 : i32
    %98 = tpu.dynamic_rotate %79 by %c1_i32_44 dim 1 : vector<8x512xf32>, i32 -> vector<8x512xf32>
    %c3_45 = arith.constant 3 : index
    %c0_46 = arith.constant 0 : index
    %c0_47 = arith.constant 0 : index
    %99 = vector.load %arg1[%c3_45, %c0_46, %c0_47] : memref<9x1x512xf32, #tpu.memory_space<vmem>>, vector<1x1x512xf32>
    %100 = vector.shape_cast %99 : vector<1x1x512xf32> to vector<1x512xf32>
    %101 = vector.broadcast %100 : vector<1x512xf32> to vector<8x512xf32>
    %102 = arith.mulf %98, %101 : vector<8x512xf32>
    %103 = arith.truncf %102 : vector<8x512xf32> to vector<8x512xbf16>
    %c4_48 = arith.constant 4 : index
    %c0_49 = arith.constant 0 : index
    %c0_50 = arith.constant 0 : index
    %104 = vector.load %arg1[%c4_48, %c0_49, %c0_50] : memref<9x1x512xf32, #tpu.memory_space<vmem>>, vector<1x1x512xf32>
    %105 = vector.shape_cast %104 : vector<1x1x512xf32> to vector<1x512xf32>
    %106 = vector.broadcast %105 : vector<1x512xf32> to vector<8x512xf32>
    %107 = arith.mulf %79, %106 : vector<8x512xf32>
    %108 = arith.truncf %107 : vector<8x512xf32> to vector<8x512xbf16>
    %c511_i32_51 = arith.constant 511 : i32
    %109 = tpu.dynamic_rotate %79 by %c511_i32_51 dim 1 : vector<8x512xf32>, i32 -> vector<8x512xf32>
    %c5_52 = arith.constant 5 : index
    %c0_53 = arith.constant 0 : index
    %c0_54 = arith.constant 0 : index
    %110 = vector.load %arg1[%c5_52, %c0_53, %c0_54] : memref<9x1x512xf32, #tpu.memory_space<vmem>>, vector<1x1x512xf32>
    %111 = vector.shape_cast %110 : vector<1x1x512xf32> to vector<1x512xf32>
    %112 = vector.broadcast %111 : vector<1x512xf32> to vector<8x512xf32>
    %113 = arith.mulf %109, %112 : vector<8x512xf32>
    %114 = arith.truncf %113 : vector<8x512xf32> to vector<8x512xbf16>
    %c497_i32_55 = arith.constant 497 : i32
    %115 = tpu.dynamic_rotate %79 by %c497_i32_55 dim 1 : vector<8x512xf32>, i32 -> vector<8x512xf32>
    %c6_56 = arith.constant 6 : index
    %c0_57 = arith.constant 0 : index
    %c0_58 = arith.constant 0 : index
    %116 = vector.load %arg1[%c6_56, %c0_57, %c0_58] : memref<9x1x512xf32, #tpu.memory_space<vmem>>, vector<1x1x512xf32>
    %117 = vector.shape_cast %116 : vector<1x1x512xf32> to vector<1x512xf32>
    %118 = vector.broadcast %117 : vector<1x512xf32> to vector<8x512xf32>
    %119 = arith.mulf %115, %118 : vector<8x512xf32>
    %120 = arith.truncf %119 : vector<8x512xf32> to vector<8x512xbf16>
    %c496_i32_59 = arith.constant 496 : i32
    %121 = tpu.dynamic_rotate %79 by %c496_i32_59 dim 1 : vector<8x512xf32>, i32 -> vector<8x512xf32>
    %c7_60 = arith.constant 7 : index
    %c0_61 = arith.constant 0 : index
    %c0_62 = arith.constant 0 : index
    %122 = vector.load %arg1[%c7_60, %c0_61, %c0_62] : memref<9x1x512xf32, #tpu.memory_space<vmem>>, vector<1x1x512xf32>
    %123 = vector.shape_cast %122 : vector<1x1x512xf32> to vector<1x512xf32>
    %124 = vector.broadcast %123 : vector<1x512xf32> to vector<8x512xf32>
    %125 = arith.mulf %121, %124 : vector<8x512xf32>
    %126 = arith.truncf %125 : vector<8x512xf32> to vector<8x512xbf16>
    %c495_i32_63 = arith.constant 495 : i32
    %127 = tpu.dynamic_rotate %79 by %c495_i32_63 dim 1 : vector<8x512xf32>, i32 -> vector<8x512xf32>
    %c8_64 = arith.constant 8 : index
    %c0_65 = arith.constant 0 : index
    %c0_66 = arith.constant 0 : index
    %128 = vector.load %arg1[%c8_64, %c0_65, %c0_66] : memref<9x1x512xf32, #tpu.memory_space<vmem>>, vector<1x1x512xf32>
    %129 = vector.shape_cast %128 : vector<1x1x512xf32> to vector<1x512xf32>
    %130 = vector.broadcast %129 : vector<1x512xf32> to vector<8x512xf32>
    %131 = arith.mulf %127, %130 : vector<8x512xf32>
    %132 = arith.truncf %131 : vector<8x512xf32> to vector<8x512xbf16>
    %133 = tpu.concatenate %85, %91, %97, %103, %108, %114, %120, %126, %132 in 0 : vector<8x512xbf16>, vector<8x512xbf16>, vector<8x512xbf16>, vector<8x512xbf16>, vector<8x512xbf16>, vector<8x512xbf16>, vector<8x512xbf16>, vector<8x512xbf16>, vector<8x512xbf16> -> vector<72x512xbf16>
    %c0_67 = arith.constant 0 : index
    %c0_68 = arith.constant 0 : index
    %134 = vector.load %arg5[%c0_67, %c0_68] : memref<8x72xbf16, #tpu.memory_space<vmem>>, vector<8x72xbf16>
    %cst_69 = arith.constant dense<0.000000e+00> : vector<8x512xf32>
    %135 = tpu.matmul %134, %133, %cst_69 {dimension_numbers = #tpu.dot_dimension_numbers<[1], [0], [0], [1], [0, 0, 1, 1], [], []>} : vector<8x72xbf16>, vector<72x512xbf16>, vector<8x512xf32> -> vector<8x512xf32>
    %cst_70 = arith.constant dense<0.000000e+00> : vector<8xf32>
    %136 = vector.multi_reduction <add>, %135, %cst_70 [1] : vector<8x512xf32> to vector<8xf32>
    %137 = vector.shape_cast %136 : vector<8xf32> to vector<8x1xf32>
    %cst_71 = arith.constant 5.120000e+02 : f32
    %138 = vector.broadcast %cst_71 : f32 to vector<8x1xf32>
    %139 = arith.divf %137, %138 : vector<8x1xf32>
    %140 = vector.broadcast %139 : vector<8x1xf32> to vector<8x512xf32>
    %141 = arith.subf %135, %140 : vector<8x512xf32>
    %142 = arith.mulf %141, %141 : vector<8x512xf32>
    %cst_72 = arith.constant dense<0.000000e+00> : vector<8xf32>
    %143 = vector.multi_reduction <add>, %142, %cst_72 [1] : vector<8x512xf32> to vector<8xf32>
    %144 = vector.shape_cast %143 : vector<8xf32> to vector<8x1xf32>
    %cst_73 = arith.constant 5.120000e+02 : f32
    %145 = vector.broadcast %cst_73 : f32 to vector<8x1xf32>
    %146 = arith.divf %144, %145 : vector<8x1xf32>
    %c0_74 = arith.constant 0 : index
    %c0_75 = arith.constant 0 : index
    %147 = vector.load %arg6[%c0_74, %c0_75] : memref<8x1xf32, #tpu.memory_space<vmem>>, vector<8x1xf32>
    %cst_76 = arith.constant 9.99999974E-6 : f32
    %148 = vector.broadcast %cst_76 : f32 to vector<8x1xf32>
    %149 = arith.addf %146, %148 : vector<8x1xf32>
    %150 = math.rsqrt %149 : vector<8x1xf32>
    %151 = arith.mulf %147, %150 : vector<8x1xf32>
    %152 = vector.broadcast %151 : vector<8x1xf32> to vector<8x512xf32>
    %153 = arith.mulf %141, %152 : vector<8x512xf32>
    %c0_77 = arith.constant 0 : index
    %c0_78 = arith.constant 0 : index
    %154 = vector.load %arg7[%c0_77, %c0_78] : memref<8x1xf32, #tpu.memory_space<vmem>>, vector<8x1xf32>
    %155 = vector.broadcast %154 : vector<8x1xf32> to vector<8x512xf32>
    %156 = arith.addf %153, %155 : vector<8x512xf32>
    %c0_79 = arith.constant 0 : index
    %c0_80 = arith.constant 0 : index
    %157 = vector.load %arg8[%c0_79, %c0_80] : memref<8x4xbf16, #tpu.memory_space<vmem>>, vector<8x4xbf16>
    %158 = arith.truncf %0 : vector<4x512xf32> to vector<4x512xbf16>
    %cst_81 = arith.constant dense<0.000000e+00> : vector<8x512xf32>
    %159 = tpu.matmul %157, %158, %cst_81 {dimension_numbers = #tpu.dot_dimension_numbers<[1], [0], [0], [1], [0, 0, 1, 1], [], []>} : vector<8x4xbf16>, vector<4x512xbf16>, vector<8x512xf32> -> vector<8x512xf32>
    %cst_82 = arith.constant dense<0.000000e+00> : vector<8xf32>
    %160 = vector.multi_reduction <add>, %159, %cst_82 [1] : vector<8x512xf32> to vector<8xf32>
    %161 = vector.shape_cast %160 : vector<8xf32> to vector<8x1xf32>
    %cst_83 = arith.constant 5.120000e+02 : f32
    %162 = vector.broadcast %cst_83 : f32 to vector<8x1xf32>
    %163 = arith.divf %161, %162 : vector<8x1xf32>
    %164 = vector.broadcast %163 : vector<8x1xf32> to vector<8x512xf32>
    %165 = arith.subf %159, %164 : vector<8x512xf32>
    %166 = arith.mulf %165, %165 : vector<8x512xf32>
    %cst_84 = arith.constant dense<0.000000e+00> : vector<8xf32>
    %167 = vector.multi_reduction <add>, %166, %cst_84 [1] : vector<8x512xf32> to vector<8xf32>
    %168 = vector.shape_cast %167 : vector<8xf32> to vector<8x1xf32>
    %cst_85 = arith.constant 5.120000e+02 : f32
    %169 = vector.broadcast %cst_85 : f32 to vector<8x1xf32>
    %170 = arith.divf %168, %169 : vector<8x1xf32>
    %c0_86 = arith.constant 0 : index
    %c0_87 = arith.constant 0 : index
    %171 = vector.load %arg9[%c0_86, %c0_87] : memref<8x1xf32, #tpu.memory_space<vmem>>, vector<8x1xf32>
    %cst_88 = arith.constant 9.99999974E-6 : f32
    %172 = vector.broadcast %cst_88 : f32 to vector<8x1xf32>
    %173 = arith.addf %170, %172 : vector<8x1xf32>
    %174 = math.rsqrt %173 : vector<8x1xf32>
    %175 = arith.mulf %171, %174 : vector<8x1xf32>
    %176 = vector.broadcast %175 : vector<8x1xf32> to vector<8x512xf32>
    %177 = arith.mulf %165, %176 : vector<8x512xf32>
    %c0_89 = arith.constant 0 : index
    %c0_90 = arith.constant 0 : index
    %178 = vector.load %arg10[%c0_89, %c0_90] : memref<8x1xf32, #tpu.memory_space<vmem>>, vector<8x1xf32>
    %179 = vector.broadcast %178 : vector<8x1xf32> to vector<8x512xf32>
    %180 = arith.addf %177, %179 : vector<8x512xf32>
    %181 = arith.addf %156, %180 : vector<8x512xf32>
    %cst_91 = arith.constant 0.000000e+00 : f32
    %182 = vector.broadcast %cst_91 : f32 to vector<8x512xf32>
    %183 = arith.maximumf %181, %182 : vector<8x512xf32>
    %c0_92 = arith.constant 0 : index
    %c0_93 = arith.constant 0 : index
    %184 = vector.load %arg11[%c0_92, %c0_93] : memref<8x512xf32, #tpu.memory_space<vmem>>, vector<8x512xf32>
    tpu.vector_store %arg11[%c0_92, %c0_93], %183 {strides = array<i32>} : memref<8x512xf32, #tpu.memory_space<vmem>>, vector<8x512xf32>,
    return
  }
}

</mosaic_0001>

<bundles_post_ra>
// kernel: tpu_custom_call.1
= control target key start
LH: loop header
LB: loop body
LE: loop exit
PB: predicated region body
PF: predicated region fallthrough
CT: control target
= control target key end

     0   :  { %s2224_s0 = inlined_call_operand.vmem [shape: f32[4,512], index: 0, kind: input, shape index: {}]   ;;  %s2225_s1 = inlined_call_operand.vmem [shape: f32[9,1,512], index: 1, kind: input, shape index: {}]   ;;  %s2226_s2 = inlined_call_operand.vmem [shape: bf16[8,36], index: 2, kind: input, shape index: {}]   ;;  %s2227_s3 = inlined_call_operand.vmem [shape: f32[8,1], index: 3, kind: input, shape index: {}]   ;;  %s2228_s4 = inlined_call_operand.vmem [shape: f32[8,1], index: 4, kind: input, shape index: {}]   ;;  %s2229_s5 = inlined_call_operand.vmem [shape: bf16[8,72], index: 5, kind: input, shape index: {}]   ;;  %s2230_s6 = inlined_call_operand.vmem [shape: f32[8,1], index: 6, kind: input, shape index: {}]   ;;  %s2231_s7 = inlined_call_operand.vmem [shape: f32[8,1], index: 7, kind: input, shape index: {}]   ;;  %s2232_s8 = inlined_call_operand.vmem [shape: bf16[8,4], index: 8, kind: input, shape index: {}]   ;;  %s2233_s9 = inlined_call_operand.vmem [shape: f32[8,1], index: 9, kind: input, shape index: {}]   ;;  %s2234_s10 = inlined_call_operand.vmem [shape: f32[8,1], index: 10, kind: input, shape index: {}]   ;;  %s2235_s11 = inlined_call_operand.hbm [shape: f32[8,512], index: 11, kind: output, shape index: {}]  }
   0x1   :  { %v1443_v0 = vld [vmem:[%s2224_s0 + $0x8] sm:$0xff]  ;;  %v1448_v1 = vld [vmem:[%s2224_s0] sm:$0xff] }
   0x2   :  { %46 = vst [vmem:[#allocation1 + $0x10] ss:$2 sm:$0xff] %v1443_v0 }
   0x3   :  { %44 = vst [vmem:[#allocation1] ss:$2 sm:$0xff] %v1448_v1 }
   0x4   :  { %16 = vsyncpa [#allocation3], 0  ;;  %s1369_s21 = smov 17   ;;  %v1462_v6 = vld [vmem:[%s2225_s1 + $0x10] sm:$0xf]  ;;  %s1370_s23 = smov 16   ;;  %v63_v57 = vlaneseq }
   0x5   :  { %v2249_v9 = vperm.slane %v1462_v6, 3  ;;  %v2243_v12 = vperm.slane %v1462_v6, 1  ;;  %v2250_v13 = vperm.slane %v1462_v6, 2  ;;  %vm218_vm0 = vcmask 1043456   ;;  %s1371_s24 = smov 15   ;;  %s1372_s25 = smov 1  }
   0x6   :  { %v2244_v15 = vperm.slane %v1462_v6, 0  ;;  %s1373_s26 = smov 127   ;;  %s1374_s27 = smov 113   ;;  %v1557_v60 = vand.u32 127, %v63_v57  ;;  %v1562_v61 = vld [vmem:[%s2225_s1 + $0x4] sm:$0xf] }
   0x7   :  { %v217_v14 = vrot.slane %v2249_v9, 4  ;;  %v216_v16 = vrot.slane %v2243_v12, 4  ;;  %s1375_s28 = smov 112   ;;  %s1376_s29 = smov 111   ;;  %v1570_v63 = vld [vmem:[%s2225_s1] sm:$0xf] }
   0x8   :  { %vm105_vm1 = vcmp.lt.s32.totalorder %v1557_v60, 16  ;;  %vm65_vm2 = vcmp.lt.s32.totalorder %v1557_v60, 17  ;;  %vm187_vm3 = vcmp.lt.s32.totalorder %v1557_v60, 1  ;;  %vm146_vm4 = vcmp.lt.s32.totalorder %v1557_v60, 15  ;;  %s1292_s19 = sshll.u32 %s2235_s11, 4  ;;  %s1293_s19 = int_to_ptr.hbm [resolvable:$true] %s1292_s19 }
   0x9   :  { %v50_v2 = vld.sshfl [vmem:[#allocation1 + $0x18] sm:$0xff pattern:$0x75316420]  ;;  %v49_v3 = vld.sshfl [vmem:[#allocation1 + $0x10] sm:$0xff pattern:$0x75316420]  ;;  %v220_v21 = vsel %vm218_vm0, %v2250_v13, %v217_v14  ;;  %v219_v22 = vsel %vm218_vm0, %v2244_v15, %v216_v16 }
   0xa   :  { %61 = vrot.lane.b32.xlu1 %v50_v2, %s1369_s21  ;;  %59 = vrot.lane.b32.xlu0 %v49_v3, %s1369_s21  ;;  %88 = vst [vmem:[#allocation1 + $0x10] ss:$2 sm:$0xff] %v1443_v0  ;;  %v1455_v4 = vld.sshfl [vmem:[#allocation1] sm:$0xff pattern:$0x75316420]  ;;  %v224_v23 = vmul.f32 %v220_v21, %v1443_v0  ;;  %v223_v24 = vmul.f32 %v219_v22, %v1448_v1  ;;  %vm259_vm5 = vcmp.lt.s32.totalorder %v1557_v60, 127 }
   0xb   :  { %v48_v5 = vld.sshfl [vmem:[#allocation1 + $0x8] sm:$0xff pattern:$0x75316420]  ;;  %vm510_vm6 = vcmask 1041408   ;;  %vm300_vm7 = vcmp.lt.s32.totalorder %v1557_v60, 113  ;;  %vm341_vm8 = vcmp.lt.s32.totalorder %v1557_v60, 112 }
   0xc   :  { %86 = vst [vmem:[#allocation1] ss:$2 sm:$0xff] %v1448_v1  ;;  %57 = vrot.lane.b32.xlu2 %v48_v5, %s1369_s21  ;;  %vm382_vm9 = vcmp.lt.s32.totalorder %v1557_v60, 111  ;;  %vm531_vm10 = vcmask 1045504   ;;  %vm577_vm11 = vcmask 293888  }
  0x11   :  { %v91_v7 = vld.sshfl [vmem:[#allocation1 + $0x10] sm:$0xff pattern:$0x75316420]  ;;  %v92_v8 = vld.sshfl [vmem:[#allocation1 + $0x18] sm:$0xff pattern:$0x75316420] }
  0x12   :  { %101 = vrot.lane.b32.xlu1 %v91_v7, %s1370_s23  ;;  %129 = vst [vmem:[#allocation1 + $0x10] ss:$2 sm:$0xff] %v1443_v0  ;;  %v2238_v7 = vperm.slane %v1570_v63, 3 }
  0x13   :  { %v90_v10 = vld.sshfl [vmem:[#allocation1 + $0x8] sm:$0xff pattern:$0x75316420]  ;;  %v1467_v11 = vld.sshfl [vmem:[#allocation1] sm:$0xff pattern:$0x75316420] }
  0x14   :  { %99 = vrot.lane.b32.xlu0 %v90_v10, %s1370_s23  ;;  %127 = vst [vmem:[#allocation1] ss:$2 sm:$0xff] %v1448_v1  ;;  %103 = vrot.lane.b32.xlu2 %v92_v8, %s1370_s23  ;;  %v2239_v8 = vperm.slane %v1570_v63, 2 }
  0x19   :  { %v132_v17 = vld.sshfl [vmem:[#allocation1 + $0x10] sm:$0xff pattern:$0x75316420]  ;;  %v1479_v18 = vld.sshfl [vmem:[#allocation1 + $0x18] sm:$0xff pattern:$0x75316420] }
  0x1a   :  { %142 = vrot.lane.b32.xlu1 %v132_v17, %s1371_s24  ;;  %170 = vst [vmem:[#allocation1 + $0x10] ss:$2 sm:$0xff] %v1443_v0 }
  0x1b   :  { %v131_v19 = vld.sshfl [vmem:[#allocation1 + $0x8] sm:$0xff pattern:$0x75316420]  ;;  %v1483_v20 = vld.sshfl [vmem:[#allocation1] sm:$0xff pattern:$0x75316420] }
  0x1c   :  { %140 = vrot.lane.b32.xlu0 %v131_v19, %s1371_s24  ;;  %168 = vst [vmem:[#allocation1] ss:$2 sm:$0xff] %v1448_v1  ;;  %v1602_v19 = vld [vmem:[%s2225_s1 + $0xc] sm:$0xf] }
  0x21   :  { %v174_v25 = vld.sshfl [vmem:[#allocation1 + $0x18] sm:$0xff pattern:$0x75316420]  ;;  %v173_v26 = vld.sshfl [vmem:[#allocation1 + $0x10] sm:$0xff pattern:$0x75316420] }
  0x22   :  { %185 = vrot.lane.b32.xlu1 %v174_v25, %s1372_s25  ;;  %229 = vst [vmem:[#allocation1 + $0x10] ss:$2 sm:$0xff] %v224_v23  ;;  %v2241_v23 = vperm.slane %v1602_v19, 2 }
  0x23   :  { %v172_v27 = vld.sshfl [vmem:[#allocation1 + $0x8] sm:$0xff pattern:$0x75316420]  ;;  %v171_v28 = vld.sshfl [vmem:[#allocation1] sm:$0xff pattern:$0x75316420] }
  0x24   :  { %183 = vrot.lane.b32.xlu0 %v173_v26, %s1372_s25  ;;  %181 = vrot.lane.b32.xlu2 %v172_v27, %s1372_s25  ;;  %227 = vst [vmem:[#allocation1] ss:$2 sm:$0xff] %v223_v24  ;;  %v2240_v24 = vperm.slane %v1602_v19, 3 }
  0x29   :  { %v1498_v29 = vld.sshfl [vmem:[#allocation1 + $0x10] sm:$0xff pattern:$0x75316420]  ;;  %v1500_v30 = vld.sshfl [vmem:[#allocation1 + $0x18] sm:$0xff pattern:$0x75316420] }
  0x2a   :  { %242 = vst [vmem:[#allocation1 + $0x10] ss:$2 sm:$0xff] %v1443_v0 }
  0x2b   :  { %v1503_v31 = vld.sshfl [vmem:[#allocation1] sm:$0xff pattern:$0x75316420]  ;;  %v1505_v32 = vld.sshfl [vmem:[#allocation1 + $0x8] sm:$0xff pattern:$0x75316420] }
  0x2c   :  { %240 = vst [vmem:[#allocation1] ss:$2 sm:$0xff] %v1448_v1 }
  0x31   :  { %v246_v33 = vld.sshfl [vmem:[#allocation1 + $0x18] sm:$0xff pattern:$0x75316420]  ;;  %v245_v34 = vld.sshfl [vmem:[#allocation1 + $0x10] sm:$0xff pattern:$0x75316420] }
  0x32   :  { %257 = vrot.lane.b32.xlu1 %v246_v33, %s1373_s26  ;;  %283 = vst [vmem:[#allocation1 + $0x10] ss:$2 sm:$0xff] %v1443_v0 }
  0x33   :  { %v243_v35 = vld.sshfl [vmem:[#allocation1] sm:$0xff pattern:$0x75316420]  ;;  %v244_v36 = vld.sshfl [vmem:[#allocation1 + $0x8] sm:$0xff pattern:$0x75316420] }
  0x34   :  { %251 = vrot.lane.b32.xlu0 %v243_v35, %s1373_s26  ;;  %281 = vst [vmem:[#allocation1] ss:$2 sm:$0xff] %v1448_v1 }
  0x39   :  { %v286_v37 = vld.sshfl [vmem:[#allocation1 + $0x10] sm:$0xff pattern:$0x75316420]  ;;  %v287_v38 = vld.sshfl [vmem:[#allocation1 + $0x18] sm:$0xff pattern:$0x75316420] }
  0x3a   :  { %296 = vrot.lane.b32.xlu1 %v286_v37, %s1374_s27  ;;  %298 = vrot.lane.b32.xlu2 %v287_v38, %s1374_s27  ;;  %324 = vst [vmem:[#allocation1 + $0x10] ss:$2 sm:$0xff] %v1443_v0  ;;  %v1622_v38 = vld [vmem:[%s2225_s1 + $0x8] sm:$0xf] }
  0x3b   :  { %v284_v39 = vld.sshfl [vmem:[#allocation1] sm:$0xff pattern:$0x75316420]  ;;  %v285_v40 = vld.sshfl [vmem:[#allocation1 + $0x8] sm:$0xff pattern:$0x75316420] }
  0x3c   :  { %255 = vrot.lane.b32.xlu0 %v245_v34, %s1373_s26  ;;  %322 = vst [vmem:[#allocation1] ss:$2 sm:$0xff] %v1448_v1 }
  0x41   :  { %v327_v41 = vld.sshfl [vmem:[#allocation1 + $0x10] sm:$0xff pattern:$0x75316420]  ;;  %v328_v42 = vld.sshfl [vmem:[#allocation1 + $0x18] sm:$0xff pattern:$0x75316420] }
  0x42   :  { %337 = vrot.lane.b32.xlu1 %v327_v41, %s1375_s28  ;;  %339 = vrot.lane.b32.xlu2 %v328_v42, %s1375_s28  ;;  %365 = vst [vmem:[#allocation1 + $0x10] ss:$2 sm:$0xff] %v1443_v0 }
  0x43   :  { %v326_v43 = vld.sshfl [vmem:[#allocation1 + $0x8] sm:$0xff pattern:$0x75316420]  ;;  %v325_v44 = vld.sshfl [vmem:[#allocation1] sm:$0xff pattern:$0x75316420] }
  0x44   :  { %253 = vrot.lane.b32.xlu0 %v244_v36, %s1373_s26  ;;  %363 = vst [vmem:[#allocation1] ss:$2 sm:$0xff] %v1448_v1 }
  0x49   :  { %v368_v45 = vld.sshfl [vmem:[#allocation1 + $0x10] sm:$0xff pattern:$0x75316420]  ;;  %v369_v46 = vld.sshfl [vmem:[#allocation1 + $0x18] sm:$0xff pattern:$0x75316420] }
  0x4a   :  { %335 = vrot.lane.b32.xlu2 %v326_v43, %s1375_s28  ;;  %1140 = vst [vmem:[#allocation1 + $0x10] ss:$2 sm:$0xff] %v1443_v0  ;;  %v2237_v0 = vperm.slane %v1562_v61, 3 }
  0x4b   :  { %v366_v47 = vld.sshfl [vmem:[#allocation1] sm:$0xff pattern:$0x75316420]  ;;  %v367_v48 = vld.sshfl [vmem:[#allocation1 + $0x8] sm:$0xff pattern:$0x75316420] }
  0x4c   :  { %292 = vrot.lane.b32.xlu0 %v284_v39, %s1374_s27  ;;  %374 = vrot.lane.b32.xlu1 %v366_v47, %s1376_s29  ;;  %1138 = vst [vmem:[#allocation1] ss:$2 sm:$0xff] %v1448_v1  ;;  %v2236_v1 = vperm.slane %v1562_v61, 2  ;;  %v1635_v47 = vld [vmem:[%s2225_s1 + $0x14] sm:$0xf] }
  0x52   :  { %378 = vrot.lane.b32.xlu2 %v368_v45, %s1376_s29  ;;  %v2242_v45 = vperm.slane %v1622_v38, 2 }
  0x54   :  { %333 = vrot.lane.b32.xlu0 %v325_v44, %s1375_s28  ;;  %97 = vrot.lane.b32.xlu1 %v1467_v11, %s1370_s23  ;;  %v239_v44 = vpack.c.bf16 %v1500_v30, %v1498_v29  ;;  %v1646_v30 = vld [vmem:[%s2225_s1 + $0x18] sm:$0xf] }
  0x5a   :  { %380 = vrot.lane.b32.xlu2 %v369_v46, %s1376_s29 }
  0x5c   :  { %294 = vrot.lane.b32.xlu0 %v285_v40, %s1374_s27  ;;  %376 = vrot.lane.b32.xlu1 %v367_v48, %s1376_s29 }
  0x62   :  { %144 = vrot.lane.b32.xlu2 %v1479_v18, %s1371_s24 }
  0x64   :  { %179 = vrot.lane.b32.xlu0 %v171_v28, %s1372_s25  ;;  %138 = vrot.lane.b32.xlu1 %v1483_v20, %s1371_s24 }
  0x66   :  { %v1541_v49 = vpop.permute.xlu2 %57 }
  0x6a   :  { %55 = vrot.lane.b32.xlu2 %v1455_v4, %s1369_s21 }
  0x6e   :  { %v1545_v52 = vpop.permute.xlu2 %103 }
  0x7c   :  { %v1543_v50 = vpop.permute.xlu1 %61  ;;  %v60_v51 = vpop.permute.xlu0 %59 }
  0x7d   :  { %v66_v10 = vsel %vm65_vm2, %v60_v51, %v1543_v50  ;;  %v67_v11 = vsel %vm65_vm2, %v1541_v49, %v60_v51  ;;  %v2248_v51 = vperm.slane %v1635_v47, 2 }
  0x7e   :  { %v1549_v55 = vpop.permute.xlu2 %181  ;;  %v83_v17 = vmul.f32 %v2238_v7, %v66_v10  ;;  %v82_v18 = vmul.f32 %v2239_v8, %v67_v11  ;;  %v2247_v10 = vperm.slane %v1635_v47, 3  ;;  %v1655_v11 = vld [vmem:[%s2225_s1 + $0x1c] sm:$0xf] }
  0x80   :  { %v85_v25 = vpack.c.bf16 %v83_v17, %v82_v18  ;;  %v457_v17 = vunpack.c.h.b16 %v239_v44 }
  0x82   :  { %v408_v37 = vunpack.c.l.b16 %v85_v25  ;;  %v409_v41 = vunpack.c.h.b16 %v85_v25 }
  0x84   :  { %v102_v53 = vpop.permute.xlu1 %101  ;;  %v412_v48 = vpack.c.b16 %v408_v37, %v408_v37 }
  0x85   :  { %v106_v2 = vsel %vm105_vm1, %v102_v53, %v1545_v52 }
  0x86   :  { %v1547_v54 = vpop.permute.xlu0 %99  ;;  %v124_v14 = vmul.f32 %v2237_v0, %v106_v2  ;;  %v2257_v0 = vperm.slane %v1570_v63, 0 }
  0x87   :  { %v107_v3 = vsel %vm105_vm1, %v1547_v54, %v102_v53 }
  0x88   :  { %v123_v16 = vmul.f32 %v2236_v1, %v107_v3 }
  0x8a   :  { %v126_v20 = vpack.c.bf16 %v124_v14, %v123_v16  ;;  %v456_v14 = vunpack.c.l.b16 %v239_v44 }
  0x8c   :  { %v1551_v56 = vpop.permute.xlu1 %142  ;;  %v418_v33 = vunpack.c.l.b16 %v126_v20  ;;  %v419_v34 = vunpack.c.h.b16 %v126_v20  ;;  %v1686_v44 = vpack.c.b16 %v456_v14, %v456_v14 }
  0x8e   :  { %v1553_v58 = vpop.permute.xlu0 %140  ;;  %v422_v39 = vpack.c.b16 %v418_v33, %v418_v33  ;;  %v423_v40 = vpack.c.b16 %v419_v34, %v419_v34  ;;  %v238_v33 = vpack.c.bf16 %v1505_v32, %v1503_v31  ;;  %v2255_v34 = vperm.slane %v1655_v11, 1 }
  0x8f   :  { %v148_v29 = vsel %vm146_vm4, %v1553_v58, %v1551_v56  ;;  %v351_v31 = vperm.slane %v1655_v11, 2 }
  0x90   :  { %v426_v57 = vrot.slane %v422_v39, 6  ;;  %v427_v2 = vrot.slane %v423_v40, 6  ;;  %v1661_v25 = vmul.f32 %v2242_v45, %v148_v29  ;;  %v2246_v39 = vperm.slane %v1635_v47, 0 }
  0x91   :  { %v2245_v40 = vperm.slane %v1635_v47, 1  ;;  %v455_v1 = vunpack.c.h.b16 %v238_v33  ;;  %v2259_v45 = vperm.slane %v1562_v61, 0 }
  0x94   :  { %v1555_v59 = vpop.permute.xlu2 %298  ;;  %v1565_v62 = vpop.permute.xlu1 %185 }
  0x96   :  { %v184_v4 = vpop.permute.xlu0 %183 }
  0x97   :  { %v188_v26 = vsel %vm187_vm3, %v184_v4, %v1565_v62  ;;  %v189_v27 = vsel %vm187_vm3, %v1549_v55, %v184_v4  ;;  %v413_v4 = vpack.c.b16 %v409_v41, %v409_v41 }
  0x98   :  { %v205_v35 = vmul.f32 %v2241_v23, %v189_v27  ;;  %v206_v36 = vmul.f32 %v2240_v24, %v188_v26  ;;  %v2251_v26 = vperm.slane %v1646_v30, 2  ;;  %v352_v23 = vperm.slane %v1655_v11, 3 }
  0x9a   :  { %v208_v46 = vpack.c.bf16 %v206_v36, %v205_v35  ;;  %v1676_v35 = vsel %vm510_vm6, %v412_v48, %v426_v57  ;;  %v1679_v36 = vsel %vm510_vm6, %v413_v4, %v427_v2  ;;  %v454_v4 = vunpack.c.l.b16 %v238_v33 }
  0x9b   :  { %v349_v33 = vperm.slane %v1655_v11, 0 }
  0x9c   :  { %v1581_v5 = vpop.permute.xlu2 %339  ;;  %v442_v18 = vunpack.c.l.b16 %v208_v46  ;;  %v443_v20 = vunpack.c.h.b16 %v208_v46  ;;  %v1688_v46 = vpack.c.b16 %v457_v17, %v457_v17  ;;  %v2254_v17 = vperm.slane %v1646_v30, 3 }
  0x9d   :  { %v1715_v24 = vpack.c.b16 %v454_v4, %v454_v4 }
  0x9e   :  { %v1690_v48 = vpack.c.b16 %v442_v18, %v442_v18  ;;  %v1692_v57 = vpack.c.b16 %v443_v20, %v443_v20  ;;  %v2252_v18 = vperm.slane %v1622_v38, 3 }
  0xa4   :  { %v258_v21 = vpop.permute.xlu1 %257  ;;  %v1605_v22 = vpop.permute.xlu2 %335 }
  0xa6   :  { %v252_v28 = vpop.permute.xlu0 %251 }
  0xa7   :  { %v263_v16 = vsel %vm259_vm5, %v258_v21, %v252_v28 }
  0xa8   :  { %v278_v37 = vmul.f32 %v2247_v10, %v263_v16  ;;  %v1726_v10 = vpack.c.b16 %v455_v1, %v455_v1 }
  0xac   :  { %v1625_v42 = vpop.permute.xlu1 %296  ;;  %v1627_v43 = vpop.permute.xlu2 %378 }
  0xae   :  { %v256_v53 = vpop.permute.xlu0 %255 }
  0xaf   :  { %v260_v3 = vsel %vm259_vm5, %v256_v53, %v258_v21  ;;  %v1673_v21 = vld [vmem:[%s2225_s1 + $0x20] sm:$0xf] }
  0xb0   :  { %v277_v27 = vmul.f32 %v2248_v51, %v260_v3  ;;  %v2253_v3 = vperm.slane %v1673_v21, 2 }
  0xb2   :  { %v280_v2 = vpack.c.bf16 %v278_v37, %v277_v27  ;;  %v2256_v37 = vperm.slane %v1673_v21, 3 }
  0xb4   :  { %v338_v32 = vpop.permute.xlu1 %337  ;;  %v381_v41 = vpop.permute.xlu2 %380 }
  0xb5   :  { %v383_v15 = vsel %vm382_vm9, %v1627_v43, %v381_v41  ;;  %v342_v9 = vsel %vm341_vm8, %v338_v32, %v1581_v5  ;;  %v343_v1 = vsel %vm341_vm8, %v1605_v22, %v338_v32 }
  0xb6   :  { %v254_v29 = vpop.permute.xlu0 %253 }
  0xb7   :  { %v261_v16 = vsel %vm259_vm5, %v254_v29, %v256_v53  ;;  %v262_v14 = vsel %vm259_vm5, %v252_v28, %v254_v29  ;;  %v2258_v53 = vperm.slane %v1570_v63, 1  ;;  %v301_v29 = vsel %vm300_vm7, %v1625_v42, %v1555_v59 }
  0xb8   :  { %v275_v20 = vmul.f32 %v2246_v39, %v262_v14  ;;  %v276_v27 = vmul.f32 %v2245_v40, %v261_v16  ;;  %v466_v14 = vunpack.c.l.b16 %v280_v2  ;;  %v467_v16 = vunpack.c.h.b16 %v280_v2 }
  0xb9   :  { %v114_v39 = vperm.slane %v1562_v61, 1  ;;  %v318_v2 = vmul.f32 %v2251_v26, %v301_v29 }
  0xba   :  { %v279_v8 = vpack.c.bf16 %v276_v27, %v275_v20  ;;  %v1736_v51 = vpack.c.b16 %v466_v14, %v466_v14  ;;  %v1750_v26 = vpack.c.b16 %v467_v16, %v467_v16  ;;  %v400_v14 = vmul.f32 %v2253_v3, %v383_v15 }
  0xbc   :  { %v464_v12 = vunpack.c.l.b16 %v279_v8  ;;  %v1723_v40 = vpop.permute.xlu2 %144  ;;  %v465_v7 = vunpack.c.h.b16 %v279_v8  ;;  %v475_v16 = vrot.slane %v1750_v26, 6 }
  0xbd   :  { %v147_v4 = vsel %vm146_vm4, %v1551_v56, %v1723_v40 }
  0xbe   :  { %v1744_v29 = vpop.permute.xlu0 %292  ;;  %v165_v13 = vmul.f32 %v2252_v18, %v147_v4  ;;  %v1748_v56 = vpop.permute.xlu1 %374  ;;  %v468_v27 = vpack.c.b16 %v464_v12, %v464_v12  ;;  %v358_v18 = vmul.f32 %v2255_v34, %v343_v1  ;;  %v154_v34 = vperm.slane %v1622_v38, 0 }
  0xbf   :  { %v304_v28 = vsel %vm300_vm7, %v1555_v59, %v1744_v29  ;;  %v386_v32 = vsel %vm382_vm9, %v381_v41, %v1748_v56  ;;  %v359_v41 = vmul.f32 %v351_v31, %v342_v9  ;;  %v155_v59 = vperm.slane %v1622_v38, 1 }
  0xc0   :  { %v319_v4 = vmul.f32 %v2254_v17, %v304_v28  ;;  %v401_v15 = vmul.f32 %v2256_v37, %v386_v32  ;;  %v167_v12 = vpack.c.bf16 %v165_v13, %v1661_v25  ;;  %v196_v28 = vperm.slane %v1602_v19, 1 }
  0xc1   :  { %v474_v17 = vrot.slane %v1736_v51, 6  ;;  %v469_v32 = vpack.c.b16 %v465_v7, %v465_v7  ;;  %v472_v37 = vrot.slane %v468_v27, 6 }
  0xc2   :  { %v321_v8 = vpack.c.bf16 %v319_v4, %v318_v2  ;;  %v403_v1 = vpack.c.bf16 %v401_v15, %v400_v14  ;;  %v432_v26 = vunpack.c.l.b16 %v167_v12  ;;  %v433_v2 = vunpack.c.h.b16 %v167_v12 }
  0xc3   :  { %v473_v12 = vrot.slane %v469_v32, 6 }
  0xc4   :  { %v480_v3 = vunpack.c.l.b16 %v321_v8  ;;  %v56_v20 = vpop.permute.xlu2 %55  ;;  %v504_v51 = vunpack.c.l.b16 %v403_v1  ;;  %v505_v25 = vunpack.c.h.b16 %v403_v1  ;;  %v481_v1 = vunpack.c.h.b16 %v321_v8 }
  0xc5   :  { %v68_v9 = vsel %vm65_vm2, %v56_v20, %v1541_v49  ;;  %v69_v13 = vsel %vm65_vm2, %v1543_v50, %v56_v20  ;;  %v436_v8 = vpack.c.b16 %v432_v26, %v432_v26  ;;  %v1819_v26 = vsel %vm510_vm6, %v1715_v24, %v472_v37 }
  0xc6   :  { %v80_v7 = vmul.f32 %v2257_v0, %v69_v13  ;;  %v81_v27 = vmul.f32 %v2258_v53, %v68_v9  ;;  %v334_v14 = vpop.permute.xlu0 %333  ;;  %v98_v4 = vpop.permute.xlu1 %97  ;;  %v508_v13 = vpack.c.b16 %v504_v51, %v504_v51  ;;  %v484_v0 = vpack.c.b16 %v480_v3, %v480_v3 }
  0xc7   :  { %v344_v49 = vsel %vm341_vm8, %v334_v14, %v1605_v22  ;;  %v345_v50 = vsel %vm341_vm8, %v1581_v5, %v334_v14  ;;  %v108_v20 = vsel %vm105_vm1, %v98_v4, %v1547_v54  ;;  %v109_v15 = vsel %vm105_vm1, %v1545_v52, %v98_v4 }
  0xc8   :  { %v360_v9 = vmul.f32 %v352_v23, %v345_v50  ;;  %v121_v22 = vmul.f32 %v2259_v45, %v109_v15  ;;  %v122_v5 = vmul.f32 %v114_v39, %v108_v20  ;;  %v509_v14 = vpack.c.b16 %v505_v25, %v505_v25 }
  0xc9   :  { %v1806_v54 = vpack.c.bf16 %v81_v27, %v80_v7  ;;  %v357_v52 = vmul.f32 %v349_v33, %v344_v49  ;;  %v588_v50 = vsel %vm510_vm6, %v508_v13, 0  ;;  %v437_v15 = vpack.c.b16 %v433_v2, %v433_v2 }
  0xca   :  { %v362_v32 = vpack.c.bf16 %v360_v9, %v359_v41  ;;  %v125_v4 = vpack.c.bf16 %v122_v5, %v121_v22  ;;  %v591_v53 = vsel %vm510_vm6, %v509_v14, 0  ;;  %624 = vmatpush.bf16.msra.mxu2 %v588_v50  ;;  %v552_v51 = vsel %vm510_vm6, %v1686_v44, %v474_v17 }
  0xcb   :  { %637 = vmatpush.bf16.msra.mxu3 %v591_v53  ;;  %v555_v25 = vsel %vm510_vm6, %v1688_v46, %v475_v16  ;;  %v561_v7 = vsel %vm218_vm0, %v552_v51, %v484_v0  ;;  %v485_v41 = vpack.c.b16 %v481_v1, %v481_v1  ;;  %v1823_v2 = vsel %vm510_vm6, %v1726_v10, %v473_v12 }
  0xcc   :  { %v490_v45 = vunpack.c.l.b16 %v362_v32  ;;  %v491_v3 = vunpack.c.h.b16 %v362_v32  ;;  %v406_v53 = vunpack.c.l.b16 %v1806_v54  ;;  %v361_v27 = vpack.c.bf16 %v358_v18, %v357_v52 }
  0xcd   :  { %v528_v46 = vsel %vm218_vm0, %v1676_v35, %v436_v8  ;;  %v530_v10 = vsel %vm218_vm0, %v1679_v36, %v437_v15  ;;  %v2260_v18 = vperm.slane %v1646_v30, 0  ;;  %v416_v12 = vunpack.c.l.b16 %v125_v4 }
  0xce   :  { %v295_v49 = vpop.permute.xlu0 %294  ;;  %v377_v44 = vpop.permute.xlu1 %376  ;;  %v494_v17 = vpack.c.b16 %v490_v45, %v490_v45  ;;  %v495_v20 = vpack.c.b16 %v491_v3, %v491_v3  ;;  %v2261_v45 = vperm.slane %v1646_v30, 1  ;;  %v417_v1 = vunpack.c.h.b16 %v125_v4 }
  0xcf   :  { %v302_v0 = vsel %vm300_vm7, %v295_v49, %v1625_v42  ;;  %v303_v24 = vsel %vm300_vm7, %v1744_v29, %v295_v49  ;;  %v384_v42 = vsel %vm382_vm9, %v377_v44, %v1627_v43  ;;  %v385_v29 = vsel %vm382_vm9, %v1748_v56, %v377_v44 }
  0xd0   :  { %v316_v37 = vmul.f32 %v2260_v18, %v303_v24  ;;  %v317_v16 = vmul.f32 %v2261_v45, %v302_v0  ;;  %v2262_v35 = vperm.slane %v1673_v21, 0  ;;  %v2263_v36 = vperm.slane %v1673_v21, 1 }
  0xd1   :  { %v498_v13 = vrot.slane %v494_v17, 2  ;;  %v499_v14 = vrot.slane %v495_v20, 2  ;;  %v488_v52 = vunpack.c.l.b16 %v361_v27  ;;  %v563_v32 = vsel %vm218_vm0, %v555_v25, %v485_v41 }
  0xd2   :  { %v398_v9 = vmul.f32 %v2262_v35, %v385_v29  ;;  %v399_v22 = vmul.f32 %v2263_v36, %v384_v42  ;;  %v320_v5 = vpack.c.bf16 %v317_v16, %v316_v37  ;;  %v2264_v43 = vrot.slane %v1690_v48, 2  ;;  %v576_v36 = vld [vmem:[%s2226_s2] sm:$0xf] }
  0xd3   :  { %v2265_v56 = vrot.slane %v1692_v57, 2  ;;  %v571_v3 = vsel %vm531_vm10, %v561_v7, %v498_v13  ;;  %v574_v49 = vsel %vm531_vm10, %v563_v32, %v499_v14  ;;  %v420_v44 = vpack.c.b16 %v416_v12, %v416_v12 }
  0xd4   :  { %v539_v8 = vsel %vm531_vm10, %v528_v46, %v2264_v43  ;;  %v402_v50 = vpack.c.bf16 %v399_v22, %v398_v9  ;;  %v478_v15 = vunpack.c.l.b16 %v320_v5  ;;  %v479_v51 = vunpack.c.h.b16 %v320_v5  ;;  %625 = vmatpush.bf16.msra.mxu2 %v571_v3  ;;  %638 = vmatpush.bf16.msra.mxu3 %v574_v49 }
  0xd5   :  { %v542_v4 = vsel %vm531_vm10, %v530_v10, %v2265_v56  ;;  %v489_v41 = vunpack.c.h.b16 %v361_v27  ;;  %v421_v48 = vpack.c.b16 %v417_v1, %v417_v1  ;;  %v492_v57 = vpack.c.b16 %v488_v52, %v488_v52 }
  0xd6   :  { %v502_v17 = vunpack.c.l.b16 %v402_v50  ;;  %v503_v25 = vunpack.c.h.b16 %v402_v50  ;;  %v180_v20 = vpop.permute.xlu0 %179  ;;  %v139_v0 = vpop.permute.xlu1 %138  ;;  %v482_v24 = vpack.c.b16 %v478_v15, %v478_v15  ;;  %v483_v46 = vpack.c.b16 %v479_v51, %v479_v51 }
  0xd7   :  { %v190_v10 = vsel %vm187_vm3, %v180_v20, %v1549_v55  ;;  %v191_v7 = vsel %vm187_vm3, %v1565_v62, %v180_v20  ;;  %v149_v18 = vsel %vm146_vm4, %v139_v0, %v1553_v58  ;;  %v150_v27 = vsel %vm146_vm4, %v1723_v40, %v139_v0 }
  0xd8   :  { %v2266_v37 = vperm.slane %v1602_v19, 0  ;;  %v204_v16 = vmul.f32 %v196_v28, %v190_v10  ;;  %v162_v55 = vmul.f32 %v154_v34, %v150_v27  ;;  %v163_v62 = vmul.f32 %v155_v59, %v149_v18  ;;  %626 = vmatpush.bf16.msra.mxu2 %v539_v8  ;;  %639 = vmatpush.bf16.msra.mxu3 %v542_v4 }
  0xd9   :  { %v407_v42 = vunpack.c.h.b16 %v1806_v54  ;;  %v506_v58 = vpack.c.b16 %v502_v17, %v502_v17  ;;  %v507_v29 = vpack.c.b16 %v503_v25, %v503_v25  ;;  %v493_v12 = vpack.c.b16 %v489_v41, %v489_v41 }
  0xda   :  { %v203_v45 = vmul.f32 %v2266_v37, %v191_v7  ;;  %v410_v40 = vpack.c.b16 %v406_v53, %v406_v53  ;;  %v424_v1 = vrot.slane %v420_v44, 6  ;;  %v166_v9 = vpack.c.bf16 %v163_v62, %v162_v55 }
  0xdb   :  { %v425_v22 = vrot.slane %v421_v48, 6  ;;  %v582_v5 = vsel %vm510_vm6, %v506_v58, 0  ;;  %v585_v13 = vsel %vm510_vm6, %v507_v29, 0  ;;  %v557_v54 = vsel %vm218_vm0, %v1819_v26, %v482_v24  ;;  %1311 = vmatmul.msk.bf16.vlgmr.msra.gmra.mxu2 %vm577_vm11, %v576_v36  ;;  %1312 = vmatmul.msk.bf16.vlgmr.msra.gmra.mxu3 %vm577_vm11, %v576_v36 }
  0xdc   :  { %v207_v35 = vpack.c.bf16 %v204_v16, %v203_v45  ;;  %v430_v14 = vunpack.c.l.b16 %v166_v9  ;;  %v431_v52 = vunpack.c.h.b16 %v166_v9  ;;  %598 = vmatpush.bf16.msra.mxu0 %v582_v5  ;;  %611 = vmatpush.bf16.msra.mxu1 %v585_v13  ;;  %v559_v53 = vsel %vm218_vm0, %v1823_v2, %v483_v46 }
  0xdd   :  { %v411_v43 = vpack.c.b16 %v407_v42, %v407_v42  ;;  %v496_v8 = vrot.slane %v492_v57, 2  ;;  %v497_v56 = vrot.slane %v493_v12, 2  ;;  %v513_v26 = vsel %vm510_vm6, %v410_v40, %v424_v1 }
  0xde   :  { %v440_v32 = vunpack.c.l.b16 %v207_v35  ;;  %v441_v4 = vunpack.c.h.b16 %v207_v35  ;;  %v434_v50 = vpack.c.b16 %v430_v14, %v430_v14  ;;  %v435_v51 = vpack.c.b16 %v431_v52, %v431_v52 }
  0xdf   :  { %v565_v3 = vsel %vm531_vm10, %v557_v54, %v496_v8  ;;  %v568_v49 = vsel %vm531_vm10, %v559_v53, %v497_v56  ;;  %v516_v2 = vsel %vm510_vm6, %v411_v43, %v425_v22  ;;  %v1377_v62 = vmov 512.0   ;;  %v694_v56 = vld [vmem:[%s2228_s4] sm:$0xff] }
  0xe0   :  { %v444_v15 = vpack.c.b16 %v440_v32, %v440_v32  ;;  %v445_v44 = vpack.c.b16 %v441_v4, %v441_v4  ;;  %599 = vmatpush.bf16.msra.mxu0 %v565_v3  ;;  %612 = vmatpush.bf16.msra.mxu1 %v568_v49  ;;  %v524_v25 = vsel %vm218_vm0, %v513_v26, %v434_v50  ;;  %1335 = vrcp.f32 %v1377_v62 }
  0xe1   :  { %v526_v41 = vsel %vm218_vm0, %v516_v2, %v435_v51  ;;  %v1378_v4 = vmov 0  }
  0xe2   :  { %v448_v17 = vrot.slane %v444_v15, 2  ;;  %v449_v48 = vrot.slane %v445_v44, 2  ;;  %1332 = vset.pattern.permute.xlu1 %v1378_v4  ;;  %1333 = vset.pattern.permute.xlu0 %v1378_v4 }
  0xe3   :  { %697 = vperm.xlu1 %1332, %v694_v56   ;;  %1334 = vset.pattern.permute.xlu2 %v1378_v4 }
  0xe4   :  { %v533_v20 = vsel %vm531_vm10, %v524_v25, %v448_v17  ;;  %v536_v0 = vsel %vm531_vm10, %v526_v41, %v449_v48  ;;  %v672_v17 = vld [vmem:[%s2227_s3] sm:$0xff] }
  0xe5   :  { %600 = vmatpush.bf16.msra.mxu0 %v533_v20  ;;  %613 = vmatpush.bf16.msra.mxu1 %v536_v0 }
  0xe6   :  { %v1336_v42 = vpop.eup %1335 }
  0xe7   :  { %v651_v58 = vmul.f32 512.0, %v1336_v42  ;;  %vm655_vm12 = vweird.f32 %v1336_v42 }
  0xe8   :  { %1309 = vmatmul.msk.bf16.vlgmr.msra.gmra.mxu0 %vm577_vm11, %v576_v36  ;;  %1310 = vmatmul.msk.bf16.vlgmr.msra.gmra.mxu1 %vm577_vm11, %v576_v36 }
  0xe9   :  { %v652_v29 = vsub.f32 1.0, %v651_v58 }
  0xeb   :  { %v653_v12 = vmul.f32 %v1336_v42, %v652_v29 }
  0xed   :  { %v654_v40 = vadd.f32 %v1336_v42, %v653_v12 }
  0xef   :  { %v1901_v1 = vsel %vm655_vm12, %v1336_v42, %v654_v40 }
 0x155   :  { %v698_v20 = vpop.permute.xlu1 %697 }
 0x15e   :  { %v628_v24 = vpop.f32.mrf.mxu2  ;;  %v641_v57 = vpop.f32.mrf.mxu3 }
 0x165   :  { %v602_v46 = vpop.f32.mrf.mxu0  ;;  %v615_v10 = vpop.f32.mrf.mxu1 }
 0x166   :  { %v645_v7 = vadd.f32 %v615_v10, %v602_v46  ;;  %v630_v27 = vpop.f32.mrf.mxu2  ;;  %v643_v37 = vpop.f32.mrf.mxu3 }
 0x168   :  { %v646_v18 = vadd.f32 %v645_v7, %v628_v24 }
 0x16a   :  { %v647_v45 = vadd.f32 %v646_v18, %v641_v57 }
 0x16c   :  { %648 = vadd.xlane.f32.xlu2 %v647_v45 }
 0x16d   :  { %v604_v16 = vpop.f32.mrf.mxu0  ;;  %v617_v55 = vpop.f32.mrf.mxu1 }
 0x1df   :  { %v649_v35 = vpop.xlane.xlu2 %648 }
 0x1e0   :  { %v657_v9 = vmul.f32 %v1901_v1, %v649_v35 }
 0x1e2   :  { %v658_v36 = vsub.f32 %v602_v46, %v657_v9  ;;  %v659_v22 = vsub.f32 %v615_v10, %v657_v9  ;;  %v660_v5 = vsub.f32 %v628_v24, %v657_v9  ;;  %v661_v13 = vsub.f32 %v641_v57, %v657_v9 }
 0x1e3   :  { %v2267_v9 = vperm.slane %v1673_v21, 0 }
 0x1e4   :  { %v662_v54 = vmul.f32 %v658_v36, %v658_v36  ;;  %v663_v14 = vmul.f32 %v659_v22, %v659_v22  ;;  %v664_v52 = vmul.f32 %v660_v5, %v660_v5  ;;  %v665_v32 = vmul.f32 %v661_v13, %v661_v13 }
 0x1e6   :  { %v666_v53 = vadd.f32 %v663_v14, %v662_v54 }
 0x1e8   :  { %v667_v43 = vadd.f32 %v666_v53, %v664_v52 }
 0x1ea   :  { %v668_v8 = vadd.f32 %v667_v43, %v665_v32 }
 0x1ec   :  { %669 = vadd.xlane.f32.xlu0 %v668_v8 }
 0x25f   :  { %v670_v50 = vpop.xlane.xlu0 %669 }
 0x260   :  { %v671_v15 = vmul.f32 %v670_v50, %v1901_v1  ;;  %v2269_v50 = vperm.slane %v1673_v21, 2 }
 0x262   :  { %v673_v26 = vadd.f32 1e-05, %v671_v15 }
 0x264   :  { %1337 = vrsqrt.f32 %v673_v26  ;;  %vm680_vm14 = vweird.f32 %v673_v26 }
 0x26a   :  { %v1338_v51 = vpop.eup %1337 }
 0x26b   :  { %v675_v3 = vmul.f32 %v1338_v51, %v673_v26  ;;  %vm681_vm13 = vweird.f32 %v1338_v51  ;;  %v2270_v26 = vperm.slane %v1673_v21, 3 }
 0x26c   :  { %vm682_vm15 = vmor %vm680_vm14, %vm681_vm13 }
 0x26d   :  { %v676_v49 = vmul.f32 %v1338_v51, %v675_v3 }
 0x26f   :  { %v677_v44 = vmul.f32 0.5, %v676_v49 }
 0x271   :  { %v678_v2 = vsub.f32 1.5, %v677_v44 }
 0x273   :  { %v679_v25 = vmul.f32 %v1338_v51, %v678_v2 }
 0x275   :  { %v683_v41 = vsel %vm682_vm15, %v1338_v51, %v679_v25 }
 0x276   :  { %v684_v48 = vmul.f32 %v683_v41, %v672_v17 }
 0x278   :  { %687 = vperm.xlu1 %1332, %v684_v48  }
 0x2ea   :  { %v688_v0 = vpop.permute.xlu1 %687 }
 0x2eb   :  { %v690_v24 = vmul.f32 %v688_v0, %v658_v36  ;;  %v693_v57 = vmul.f32 %v688_v0, %v661_v13  ;;  %v691_v7 = vmul.f32 %v688_v0, %v659_v22  ;;  %v692_v37 = vmul.f32 %v688_v0, %v660_v5 }
 0x2ec   :  { %v2268_v5 = vperm.slane %v1673_v21, 1 }
 0x2ed   :  { %v700_v46 = vadd.f32 %v698_v20, %v690_v24  ;;  %v703_v10 = vadd.f32 %v698_v20, %v693_v57  ;;  %v701_v45 = vadd.f32 %v698_v20, %v691_v7  ;;  %v702_v16 = vadd.f32 %v698_v20, %v692_v37 }
 0x2ef   :  { %v1911_v18 = vmax.f32 %v700_v46, 0.0  ;;  %v1913_v27 = vmax.f32 %v703_v10, 0.0  ;;  %v1921_v55 = vmax.f32 %v701_v45, 0.0  ;;  %v1923_v62 = vmax.f32 %v702_v16, 0.0 }
 0x2f0   :  { %v2271_v45 = vperm.slane %v1646_v30, 2 }
 0x2f1   :  { %814 = vrot.lane.b32.xlu0 %v1913_v27, %s1374_s27  ;;  %808 = vrot.lane.b32.xlu2 %v1911_v18, %s1374_s27 }
 0x2f2   :  { %844 = vrot.lane.b32.xlu1 %v1911_v18, %s1376_s29 }
 0x2f9   :  { %846 = vrot.lane.b32.xlu0 %v1921_v55, %s1376_s29  ;;  %832 = vrot.lane.b32.xlu2 %v1913_v27, %s1375_s28 }
 0x2fa   :  { %848 = vrot.lane.b32.xlu1 %v1923_v62, %s1376_s29 }
 0x301   :  { %796 = vrot.lane.b32.xlu0 %v1913_v27, %s1373_s26  ;;  %794 = vrot.lane.b32.xlu2 %v1923_v62, %s1373_s26 }
 0x302   :  { %850 = vrot.lane.b32.xlu1 %v1913_v27, %s1376_s29 }
 0x309   :  { %746 = vrot.lane.b32.xlu0 %v1921_v55, %s1371_s24  ;;  %828 = vrot.lane.b32.xlu2 %v1921_v55, %s1375_s28 }
 0x30a   :  { %812 = vrot.lane.b32.xlu1 %v1923_v62, %s1374_s27 }
 0x311   :  { %764 = vrot.lane.b32.xlu0 %v1921_v55, %s1372_s25  ;;  %750 = vrot.lane.b32.xlu2 %v1913_v27, %s1371_s24 }
 0x312   :  { %826 = vrot.lane.b32.xlu1 %v1911_v18, %s1375_s28 }
 0x319   :  { %792 = vrot.lane.b32.xlu0 %v1921_v55, %s1373_s26  ;;  %768 = vrot.lane.b32.xlu2 %v1913_v27, %s1372_s25 }
 0x31a   :  { %830 = vrot.lane.b32.xlu1 %v1923_v62, %s1375_s28 }
 0x321   :  { %714 = vrot.lane.b32.xlu0 %v1913_v27, %s1369_s21  ;;  %712 = vrot.lane.b32.xlu2 %v1923_v62, %s1369_s21 }
 0x322   :  { %790 = vrot.lane.b32.xlu1 %v1911_v18, %s1373_s26 }
 0x329   :  { %732 = vrot.lane.b32.xlu0 %v1913_v27, %s1370_s23  ;;  %730 = vrot.lane.b32.xlu2 %v1923_v62, %s1370_s23 }
 0x32a   :  { %810 = vrot.lane.b32.xlu1 %v1921_v55, %s1374_s27 }
 0x331   :  { %708 = vrot.lane.b32.xlu0 %v1911_v18, %s1369_s21  ;;  %762 = vrot.lane.b32.xlu2 %v1911_v18, %s1372_s25 }
 0x332   :  { %748 = vrot.lane.b32.xlu1 %v1923_v62, %s1371_s24 }
 0x33a   :  { %766 = vrot.lane.b32.xlu1 %v1923_v62, %s1372_s25 }
 0x342   :  { %710 = vrot.lane.b32.xlu1 %v1921_v55, %s1369_s21 }
 0x34a   :  { %728 = vrot.lane.b32.xlu1 %v1921_v55, %s1370_s23 }
 0x34b   :  { %v1983_v29 = vpop.permute.xlu2 %808 }
 0x352   :  { %744 = vrot.lane.b32.xlu1 %v1911_v18, %s1371_s24 }
 0x353   :  { %v833_v53 = vpop.permute.xlu2 %832 }
 0x35a   :  { %726 = vrot.lane.b32.xlu1 %v1911_v18, %s1370_s23 }
 0x35b   :  { %v795_v0 = vpop.permute.xlu2 %794 }
 0x363   :  { %v815_v42 = vpop.permute.xlu0 %814  ;;  %v829_v37 = vpop.permute.xlu2 %828 }
 0x364   :  { %v845_v58 = vpop.permute.xlu1 %844  ;;  %v819_v7 = vsel %vm300_vm7, %v815_v42, %v1983_v29 }
 0x36b   :  { %v847_v12 = vpop.permute.xlu0 %846 }
 0x36c   :  { %v854_v40 = vsel %vm382_vm9, %v845_v58, %v847_v12  ;;  %v849_v35 = vpop.permute.xlu1 %848 }
 0x36d   :  { %v856_v36 = vmul.f32 %v854_v40, %v2267_v9  ;;  %v853_v22 = vsel %vm382_vm9, %v847_v12, %v849_v35 }
 0x36e   :  { %v857_v13 = vmul.f32 %v853_v22, %v2268_v5 }
 0x370   :  { %v860_v54 = vpack.c.bf16 %v857_v13, %v856_v36  ;;  %v2273_v13 = vperm.slane %v1462_v6, 2 }
 0x372   :  { %v944_v14 = vunpack.c.l.b16 %v860_v54  ;;  %v945_v52 = vunpack.c.h.b16 %v860_v54  ;;  %v786_v54 = vmul.f32 %v1923_v62, %v2273_v13 }
 0x373   :  { %v797_v44 = vpop.permute.xlu0 %796 }
 0x374   :  { %v851_v32 = vpop.permute.xlu1 %850  ;;  %v948_v43 = vpack.c.b16 %v944_v14, %v944_v14  ;;  %v949_v8 = vpack.c.b16 %v945_v52, %v945_v52  ;;  %v2274_v14 = vperm.slane %v1462_v6, 3 }
 0x375   :  { %v852_v56 = vsel %vm382_vm9, %v849_v35, %v851_v32  ;;  %v855_v4 = vsel %vm382_vm9, %v851_v32, %v845_v58  ;;  %v2272_v58 = vperm.slane %v1646_v30, 3 }
 0x376   :  { %v858_v15 = vmul.f32 %v852_v56, %v2269_v50  ;;  %v859_v51 = vmul.f32 %v855_v4, %v2270_v26  ;;  %v1022_v3 = vsel %vm218_vm0, %v948_v43, 0  ;;  %v1025_v49 = vsel %vm218_vm0, %v949_v8, 0  ;;  %v2035_v56 = vpop.permute.xlu2 %750 }
 0x377   :  { %1036 = vmatpush.bf16.msrb.mxu0 %v1022_v3  ;;  %1049 = vmatpush.bf16.msrb.mxu1 %v1025_v49  ;;  %v823_v12 = vmul.f32 %v819_v7, %v2272_v58  ;;  %v787_v52 = vmul.f32 %v1913_v27, %v2274_v14  ;;  %v2275_v3 = vperm.slane %v1635_v47, 2  ;;  %v2281_v14 = vperm.slane %v1462_v6, 1 }
 0x378   :  { %v861_v2 = vpack.c.bf16 %v859_v51, %v858_v15 }
 0x379   :  { %v789_v50 = vpack.c.bf16 %v787_v52, %v786_v54  ;;  %v785_v52 = vmul.f32 %v1921_v55, %v2281_v14 }
 0x37a   :  { %v946_v17 = vunpack.c.l.b16 %v861_v2  ;;  %v947_v25 = vunpack.c.h.b16 %v861_v2 }
 0x37b   :  { %v2007_v57 = vpop.permute.xlu0 %746  ;;  %v906_v7 = vunpack.c.l.b16 %v789_v50 }
 0x37c   :  { %v2003_v41 = vpop.permute.xlu1 %812  ;;  %v950_v48 = vpack.c.b16 %v946_v17, %v946_v17  ;;  %v951_v20 = vpack.c.b16 %v947_v25, %v947_v25 }
 0x37d   :  { %v816_v10 = vsel %vm300_vm7, %v2003_v41, %v815_v42  ;;  %v910_v13 = vpack.c.b16 %v906_v7, %v906_v7 }
 0x37e   :  { %v1028_v24 = vsel %vm218_vm0, %v950_v48, 0  ;;  %v1031_v21 = vsel %vm218_vm0, %v951_v20, 0  ;;  %v822_v16 = vmul.f32 %v816_v10, %v2271_v45  ;;  %v2276_v48 = vperm.slane %v1635_v47, 3 }
 0x37f   :  { %1062 = vmatpush.bf16.msrb.mxu2 %v1028_v24  ;;  %1075 = vmatpush.bf16.msrb.mxu3 %v1031_v21 }
 0x380   :  { %v825_v9 = vpack.c.bf16 %v823_v12, %v822_v16  ;;  %v907_v12 = vunpack.c.h.b16 %v789_v50 }
 0x382   :  { %v926_v43 = vunpack.c.l.b16 %v825_v9  ;;  %v927_v8 = vunpack.c.h.b16 %v825_v9 }
 0x383   :  { %v2019_v40 = vpop.permute.xlu0 %764 }
 0x384   :  { %v827_v46 = vpop.permute.xlu1 %826  ;;  %v930_v15 = vpack.c.b16 %v926_v43, %v926_v43  ;;  %v931_v51 = vpack.c.b16 %v927_v8, %v927_v8 }
 0x385   :  { %v837_v35 = vsel %vm341_vm8, %v833_v53, %v827_v46  ;;  %v836_v10 = vsel %vm341_vm8, %v827_v46, %v829_v37  ;;  %v2061_v46 = vpop.permute.xlu2 %768 }
 0x386   :  { %v841_v42 = vmul.f32 %v837_v35, %v352_v23  ;;  %v2278_v35 = vperm.slane %v1635_v47, 0 }
 0x38b   :  { %v793_v27 = vpop.permute.xlu0 %792 }
 0x38c   :  { %v831_v36 = vpop.permute.xlu1 %830  ;;  %v799_v45 = vsel %vm259_vm5, %v793_v27, %v795_v0 }
 0x38d   :  { %v834_v22 = vsel %vm341_vm8, %v831_v36, %v833_v53  ;;  %v798_v53 = vsel %vm259_vm5, %v795_v0, %v797_v44  ;;  %v835_v2 = vsel %vm341_vm8, %v829_v37, %v831_v36  ;;  %v838_v36 = vmul.f32 %v836_v10, %v349_v33 }
 0x38e   :  { %v840_v5 = vmul.f32 %v834_v22, %v351_v31  ;;  %v804_v49 = vmul.f32 %v798_v53, %v2275_v3  ;;  %v2279_v37 = vperm.slane %v1635_v47, 1  ;;  %v2280_v0 = vperm.slane %v1462_v6, 0 }
 0x38f   :  { %v911_v33 = vpack.c.b16 %v907_v12, %v907_v12  ;;  %v2283_v6 = vperm.slane %v1646_v30, 1 }
 0x390   :  { %v843_v32 = vpack.c.bf16 %v841_v42, %v840_v5  ;;  %v803_v5 = vmul.f32 %v799_v45, %v2279_v37  ;;  %v784_v54 = vmul.f32 %v1911_v18, %v2280_v0  ;;  %v2282_v18 = vperm.slane %v1646_v30, 0 }
 0x392   :  { %v936_v23 = vunpack.c.l.b16 %v843_v32  ;;  %v937_v4 = vunpack.c.h.b16 %v843_v32 }
 0x393   :  { %v715_v14 = vpop.permute.xlu0 %714 }
 0x394   :  { %v791_v31 = vpop.permute.xlu1 %790  ;;  %v940_v26 = vpack.c.b16 %v936_v23, %v936_v23  ;;  %v941_v62 = vpack.c.b16 %v937_v4, %v937_v4 }
 0x395   :  { %v801_v17 = vsel %vm259_vm5, %v797_v44, %v791_v31  ;;  %v800_v25 = vsel %vm259_vm5, %v791_v31, %v793_v27  ;;  %v2277_v44 = vperm.slane %v1655_v11, 1 }
 0x396   :  { %v805_v20 = vmul.f32 %v801_v17, %v2276_v48  ;;  %v1010_v24 = vsel %vm218_vm0, %v930_v15, %v940_v26  ;;  %v1014_v21 = vsel %vm218_vm0, %v931_v51, %v941_v62  ;;  %v802_v9 = vmul.f32 %v800_v25, %v2278_v35 }
 0x397   :  { %1063 = vmatpush.bf16.msrb.mxu2 %v1010_v24  ;;  %1076 = vmatpush.bf16.msrb.mxu3 %v1014_v21  ;;  %v839_v16 = vmul.f32 %v835_v2, %v2277_v44  ;;  %v788_v15 = vpack.c.bf16 %v785_v52, %v784_v54  ;;  %v713_v24 = vpop.permute.xlu2 %712  ;;  %v2285_v35 = vperm.slane %v1622_v38, 3  ;;  %v2286_v52 = vperm.slane %v1602_v19, 2 }
 0x398   :  { %v807_v58 = vpack.c.bf16 %v805_v20, %v804_v49  ;;  %v806_v53 = vpack.c.bf16 %v803_v5, %v802_v9 }
 0x399   :  { %v842_v32 = vpack.c.bf16 %v839_v16, %v838_v36  ;;  %v904_v27 = vunpack.c.l.b16 %v788_v15  ;;  %v905_v2 = vunpack.c.h.b16 %v788_v15 }
 0x39a   :  { %v916_v22 = vunpack.c.l.b16 %v807_v58  ;;  %v917_v42 = vunpack.c.h.b16 %v807_v58  ;;  %v914_v49 = vunpack.c.l.b16 %v806_v53  ;;  %v2284_v58 = vperm.slane %v1622_v38, 2 }
 0x39b   :  { %v934_v51 = vunpack.c.l.b16 %v842_v32  ;;  %v908_v36 = vpack.c.b16 %v904_v27, %v904_v27  ;;  %v2289_v27 = vperm.slane %v1570_v63, 3 }
 0x39c   :  { %v811_v43 = vpop.permute.xlu1 %810  ;;  %v920_v11 = vpack.c.b16 %v916_v22, %v916_v22  ;;  %v921_v8 = vpack.c.b16 %v917_v42, %v917_v42  ;;  %v918_v44 = vpack.c.b16 %v914_v49, %v914_v49  ;;  %v909_v22 = vpack.c.b16 %v905_v2, %v905_v2 }
 0x39d   :  { %v817_v47 = vsel %vm300_vm7, %v811_v43, %v2003_v41  ;;  %v818_v23 = vsel %vm300_vm7, %v1983_v29, %v811_v43  ;;  %v935_v41 = vunpack.c.h.b16 %v842_v32  ;;  %v915_v29 = vunpack.c.h.b16 %v806_v53 }
 0x39e   :  { %v820_v4 = vmul.f32 %v818_v23, %v2282_v18  ;;  %v821_v55 = vmul.f32 %v817_v47, %v2283_v6  ;;  %v994_v50 = vsel %vm218_vm0, %v910_v13, %v920_v11  ;;  %v998_v31 = vsel %vm218_vm0, %v911_v33, %v921_v8 }
 0x39f   :  { %1064 = vmatpush.bf16.msrb.mxu2 %v994_v50  ;;  %1077 = vmatpush.bf16.msrb.mxu3 %v998_v31  ;;  %v938_v30 = vpack.c.b16 %v934_v51, %v934_v51  ;;  %v939_v20 = vpack.c.b16 %v935_v41, %v935_v41  ;;  %v919_v16 = vpack.c.b16 %v915_v29, %v915_v29  ;;  %v2287_v43 = vperm.slane %v1602_v19, 3  ;;  %v731_v33 = vpop.permute.xlu2 %730 }
 0x3a0   :  { %v824_v26 = vpack.c.bf16 %v821_v55, %v820_v4  ;;  %v986_v42 = vsel %vm218_vm0, %v908_v36, %v918_v44  ;;  %v716_v41 = vsel %vm65_vm2, %v713_v24, %v715_v14 }
 0x3a1   :  { %v990_v37 = vsel %vm218_vm0, %v909_v22, %v919_v16  ;;  %v723_v2 = vmul.f32 %v716_v41, %v2289_v27  ;;  %v1144_v16 = vld.sshfl [vmem:[#allocation1 + $0x18] sm:$0xff pattern:$0x75316420]  ;;  %v2295_v27 = vperm.slane %v1562_v61, 0 }
 0x3a2   :  { %v924_v62 = vunpack.c.l.b16 %v824_v26  ;;  %v925_v3 = vunpack.c.h.b16 %v824_v26  ;;  %v1152_v22 = vpack.c.bf16 %v1144_v16, %v1144_v16 }
 0x3a4   :  { %v749_v17 = vpop.permute.xlu1 %748  ;;  %v928_v25 = vpack.c.b16 %v924_v62, %v924_v62  ;;  %v929_v48 = vpack.c.b16 %v925_v3, %v925_v3  ;;  %v2113_v62 = vpop.permute.xlu0 %732  ;;  %v2288_v3 = vperm.slane %v1570_v63, 2 }
 0x3a5   :  { %v752_v21 = vsel %vm146_vm4, %v749_v17, %v2035_v56  ;;  %v753_v10 = vsel %vm146_vm4, %v2007_v57, %v749_v17  ;;  %v734_v17 = vsel %vm105_vm1, %v731_v33, %v2113_v62 }
 0x3a6   :  { %v1002_v7 = vsel %vm218_vm0, %v928_v25, %v938_v30  ;;  %v1006_v45 = vsel %vm218_vm0, %v929_v48, %v939_v20  ;;  %v758_v12 = vmul.f32 %v753_v10, %v2284_v58  ;;  %v759_v9 = vmul.f32 %v752_v21, %v2285_v35 }
 0x3a7   :  { %1037 = vmatpush.bf16.msrb.mxu0 %v1002_v7  ;;  %1050 = vmatpush.bf16.msrb.mxu1 %v1006_v45  ;;  %v763_v29 = vpop.permute.xlu2 %762  ;;  %v2290_v10 = vperm.slane %v1562_v61, 3  ;;  %v2291_v45 = vperm.slane %v1562_v61, 2  ;;  %v2292_v58 = vperm.slane %v1602_v19, 0 }
 0x3a8   :  { %v761_v5 = vpack.c.bf16 %v759_v9, %v758_v12  ;;  %v772_v25 = vsel %vm187_vm3, %v763_v29, %v2019_v40  ;;  %v773_v30 = vsel %vm187_vm3, %v2061_v46, %v763_v29 }
 0x3a9   :  { %v741_v7 = vmul.f32 %v734_v17, %v2290_v10  ;;  %v775_v12 = vmul.f32 %v772_v25, %v196_v28 }
 0x3aa   :  { %v886_v53 = vunpack.c.l.b16 %v761_v5  ;;  %v887_v47 = vunpack.c.h.b16 %v761_v5 }
 0x3ab   :  { %1038 = vmatpush.bf16.msrb.mxu0 %v986_v42  ;;  %1051 = vmatpush.bf16.msrb.mxu1 %v990_v37 }
 0x3ac   :  { %v767_v13 = vpop.permute.xlu1 %766  ;;  %v890_v6 = vpack.c.b16 %v886_v53, %v886_v53  ;;  %v891_v50 = vpack.c.b16 %v887_v47, %v887_v47 }
 0x3ad   :  { %v770_v0 = vsel %vm187_vm3, %v767_v13, %v2061_v46  ;;  %v771_v54 = vsel %vm187_vm3, %v2019_v40, %v767_v13  ;;  %v774_v40 = vmul.f32 %v773_v30, %v2292_v58  ;;  %vm1017_vm3 = vcmask 588800  }
 0x3ae   :  { %v776_v32 = vmul.f32 %v771_v54, %v2286_v52  ;;  %v777_v11 = vmul.f32 %v770_v0, %v2287_v43  ;;  %v709_v0 = vpop.permute.xlu0 %708 }
 0x3af   :  { %v778_v5 = vpack.c.bf16 %v775_v12, %v774_v40 }
 0x3b0   :  { %v779_v8 = vpack.c.bf16 %v777_v11, %v776_v32 }
 0x3b2   :  { %v896_v23 = vunpack.c.l.b16 %v779_v8  ;;  %v897_v18 = vunpack.c.h.b16 %v779_v8  ;;  %v1167_v8 = vsel %vm510_vm6, %v1152_v22, 0 }
 0x3b4   :  { %v711_v4 = vpop.permute.xlu1 %710  ;;  %v900_v55 = vpack.c.b16 %v896_v23, %v896_v23  ;;  %v901_v31 = vpack.c.b16 %v897_v18, %v897_v18 }
 0x3b5   :  { %v717_v15 = vsel %vm65_vm2, %v711_v4, %v713_v24  ;;  %v1143_v24 = vld.sshfl [vmem:[#allocation1 + $0x10] sm:$0xff pattern:$0x75316420]  ;;  %v718_v19 = vsel %vm65_vm2, %v709_v0, %v711_v4  ;;  %v719_v4 = vsel %vm65_vm2, %v715_v14, %v709_v0 }
 0x3b6   :  { %v978_v26 = vsel %vm218_vm0, %v890_v6, %v900_v55  ;;  %v982_v51 = vsel %vm218_vm0, %v891_v50, %v901_v31  ;;  %v722_v49 = vmul.f32 %v717_v15, %v2288_v3  ;;  %v1151_v46 = vpack.c.bf16 %v1143_v24, %v1143_v24  ;;  %v1142_v24 = vld.sshfl [vmem:[#allocation1 + $0x8] sm:$0xff pattern:$0x75316420] }
 0x3b7   :  { %1065 = vmatpush.bf16.msrb.mxu2 %v978_v26  ;;  %1078 = vmatpush.bf16.msrb.mxu3 %v982_v51  ;;  %v2294_v55 = vperm.slane %v1570_v63, 0  ;;  %v1150_v60 = vpack.c.bf16 %v1142_v24, %v1142_v24 }
 0x3b8   :  { %v725_v48 = vpack.c.bf16 %v723_v2, %v722_v49  ;;  %v1164_v13 = vsel %vm510_vm6, %v1151_v46, 0 }
 0x3b9   :  { %v720_v50 = vmul.f32 %v719_v4, %v2294_v55  ;;  %v1161_v40 = vsel %vm510_vm6, %v1150_v60, 0  ;;  %v1127_v60 = vld [vmem:[%s2231_s7] sm:$0xff] }
 0x3ba   :  { %v866_v9 = vunpack.c.l.b16 %v725_v48  ;;  %v867_v36 = vunpack.c.h.b16 %v725_v48  ;;  %v1141_v48 = vld.sshfl [vmem:[#allocation1] sm:$0xff pattern:$0x75316420] }
 0x3bc   :  { %v729_v20 = vpop.permute.xlu1 %728  ;;  %v870_v52 = vpack.c.b16 %v866_v9, %v866_v9  ;;  %v871_v43 = vpack.c.b16 %v867_v36, %v867_v36 }
 0x3bd   :  { %v735_v21 = vsel %vm105_vm1, %v729_v20, %v731_v33 }
 0x3be   :  { %v740_v44 = vmul.f32 %v735_v21, %v2291_v45 }
 0x3c0   :  { %v743_v35 = vpack.c.bf16 %v741_v7, %v740_v44  ;;  %v1149_v7 = vpack.c.bf16 %v1141_v48, %v1141_v48 }
 0x3c2   :  { %v876_v42 = vunpack.c.l.b16 %v743_v35  ;;  %v877_v37 = vunpack.c.h.b16 %v743_v35  ;;  %v1137_v35 = vld [vmem:[%s2232_s8] sm:$0xf] }
 0x3c4   :  { %v745_v54 = vpop.permute.xlu1 %744  ;;  %v880_v32 = vpack.c.b16 %v876_v42, %v876_v42  ;;  %v881_v11 = vpack.c.b16 %v877_v37, %v877_v37 }
 0x3c5   :  { %v754_v28 = vsel %vm146_vm4, %v745_v54, %v2007_v57  ;;  %v755_v33 = vsel %vm146_vm4, %v2035_v56, %v745_v54  ;;  %v1016_v57 = vld [vmem:[%s2229_s5] sm:$0xf]  ;;  %v894_v56 = vunpack.c.l.b16 %v778_v5 }
 0x3c6   :  { %v756_v53 = vmul.f32 %v755_v33, %v154_v34  ;;  %v757_v47 = vmul.f32 %v754_v28, %v155_v59  ;;  %v962_v23 = vsel %vm218_vm0, %v870_v52, %v880_v32  ;;  %v966_v18 = vsel %vm218_vm0, %v871_v43, %v881_v11 }
 0x3c7   :  { %1066 = vmatpush.bf16.msrb.mxu2 %v962_v23  ;;  %1079 = vmatpush.bf16.msrb.mxu3 %v966_v18  ;;  %v2293_v34 = vperm.slane %v1570_v63, 1  ;;  %v895_v59 = vunpack.c.h.b16 %v778_v5  ;;  %v898_v15 = vpack.c.b16 %v894_v56, %v894_v56 }
 0x3c8   :  { %v760_v38 = vpack.c.bf16 %v757_v47, %v756_v53 }
 0x3c9   :  { %v721_v6 = vmul.f32 %v718_v19, %v2293_v34  ;;  %v899_v49 = vpack.c.b16 %v895_v59, %v895_v59 }
 0x3ca   :  { %1315 = vmatmul.msk.bf16.vlgmr.msrb.gmra.mxu2 %vm1017_vm3, %v1016_v57  ;;  %v884_v14 = vunpack.c.l.b16 %v760_v38  ;;  %v885_v31 = vunpack.c.h.b16 %v760_v38  ;;  %1316 = vmatmul.msk.bf16.vlgmr.msrb.gmra.mxu3 %vm1017_vm3, %v1016_v57 }
 0x3cb   :  { %1202 = vmatpush.bf16.msra.mxu2 %v1164_v13  ;;  %1215 = vmatpush.bf16.msra.mxu3 %v1167_v8  ;;  %v724_v26 = vpack.c.bf16 %v721_v6, %v720_v50 }
 0x3cc   :  { %v727_v51 = vpop.permute.xlu1 %726  ;;  %v888_v41 = vpack.c.b16 %v884_v14, %v884_v14  ;;  %v889_v3 = vpack.c.b16 %v885_v31, %v885_v31 }
 0x3cd   :  { %v736_v29 = vsel %vm105_vm1, %v727_v51, %v729_v20  ;;  %v737_v63 = vsel %vm105_vm1, %v2113_v62, %v727_v51  ;;  %v864_v20 = vunpack.c.l.b16 %v724_v26  ;;  %v865_v10 = vunpack.c.h.b16 %v724_v26 }
 0x3ce   :  { %v738_v2 = vmul.f32 %v737_v63, %v2295_v27  ;;  %v739_v17 = vmul.f32 %v736_v29, %v114_v39  ;;  %v970_v25 = vsel %vm218_vm0, %v888_v41, %v898_v15  ;;  %v974_v30 = vsel %vm218_vm0, %v889_v3, %v899_v49 }
 0x3cf   :  { %1039 = vmatpush.bf16.msrb.mxu0 %v970_v25  ;;  %1052 = vmatpush.bf16.msrb.mxu1 %v974_v30  ;;  %v868_v44 = vpack.c.b16 %v864_v20, %v864_v20  ;;  %v869_v58 = vpack.c.b16 %v865_v10, %v865_v10  ;;  %v1158_v39 = vsel %vm510_vm6, %v1149_v7, 0  ;;  %vm1153_vm1 = vcmask 31744  }
 0x3d0   :  { %v742_v21 = vpack.c.bf16 %v739_v17, %v738_v2 }
 0x3d2   :  { %v874_v62 = vunpack.c.l.b16 %v742_v21  ;;  %v875_v45 = vunpack.c.h.b16 %v742_v21 }
 0x3d4   :  { %v878_v16 = vpack.c.b16 %v874_v62, %v874_v62  ;;  %v879_v61 = vpack.c.b16 %v875_v45, %v875_v45 }
 0x3d6   :  { %v954_v12 = vsel %vm218_vm0, %v868_v44, %v878_v16  ;;  %v958_v46 = vsel %vm218_vm0, %v869_v58, %v879_v61  ;;  %v1263_v16 = vld [vmem:[%s2234_s10] sm:$0xff] }
 0x3d7   :  { %1040 = vmatpush.bf16.msrb.mxu0 %v954_v12  ;;  %1053 = vmatpush.bf16.msrb.mxu1 %v958_v46  ;;  %v1105_v46 = vld [vmem:[%s2230_s6] sm:$0xff]  ;;  %s1379_s6 = smov [#allocation2]  }
 0x3da   :  { %1313 = vmatmul.msk.bf16.vlgmr.msrb.gmra.mxu0 %vm1017_vm3, %v1016_v57  ;;  %1314 = vmatmul.msk.bf16.vlgmr.msrb.gmra.mxu1 %vm1017_vm3, %v1016_v57 }
 0x3db   :  { %1176 = vmatpush.bf16.msra.mxu0 %v1158_v39  ;;  %1189 = vmatpush.bf16.msra.mxu1 %v1161_v40 }
 0x3dc   :  { %1319 = vmatmul.msk.bf16.vlgmr.msra.gmra.mxu2 %vm1153_vm1, %v1137_v35  ;;  %1320 = vmatmul.msk.bf16.vlgmr.msra.gmra.mxu3 %vm1153_vm1, %v1137_v35 }
 0x3ea   :  { %1317 = vmatmul.msk.bf16.vlgmr.msra.gmra.mxu0 %vm1153_vm1, %v1137_v35  ;;  %1318 = vmatmul.msk.bf16.vlgmr.msra.gmra.mxu1 %vm1153_vm1, %v1137_v35 }
 0x44d   :  { %v1068_v9 = vpop.f32.mrf.mxu2  ;;  %v1081_v36 = vpop.f32.mrf.mxu3 }
 0x455   :  { %v1070_v22 = vpop.f32.mrf.mxu2  ;;  %v1083_v42 = vpop.f32.mrf.mxu3 }
 0x457   :  { %v1042_v37 = vpop.f32.mrf.mxu0  ;;  %v1055_v5 = vpop.f32.mrf.mxu1 }
 0x458   :  { %v1085_v13 = vadd.f32 %v1055_v5, %v1042_v37 }
 0x45a   :  { %v1086_v0 = vadd.f32 %v1085_v13, %v1068_v9  ;;  %v1241_v13 = vld [vmem:[%s2233_s9] sm:$0xff]  ;;  %s1290_s9 = sshll.u32 %s1379_s6, 4  ;;  %s1291_s9 = int_to_ptr.vmem [resolvable:$true] %s1290_s9 }
 0x45c   :  { %v1087_v54 = vadd.f32 %v1086_v0, %v1081_v36 }
 0x45e   :  { %1088 = vadd.xlane.f32.xlu2 %v1087_v54 }
 0x45f   :  { %v1204_v52 = vpop.f32.mrf.mxu2  ;;  %v1217_v32 = vpop.f32.mrf.mxu3 }
 0x460   :  { %v1044_v43 = vpop.f32.mrf.mxu0  ;;  %v1057_v11 = vpop.f32.mrf.mxu1 }
 0x467   :  { %v1206_v19 = vpop.f32.mrf.mxu2  ;;  %v1219_v28 = vpop.f32.mrf.mxu3 }
 0x468   :  { %v1178_v33 = vpop.f32.mrf.mxu0  ;;  %v1191_v8 = vpop.f32.mrf.mxu1 }
 0x469   :  { %v1221_v53 = vadd.f32 %v1191_v8, %v1178_v33 }
 0x46b   :  { %v1222_v47 = vadd.f32 %v1221_v53, %v1204_v52 }
 0x46d   :  { %v1223_v23 = vadd.f32 %v1222_v47, %v1217_v32 }
 0x46f   :  { %1224 = vadd.xlane.f32.xlu0 %v1223_v23 }
 0x470   :  { %v1180_v18 = vpop.f32.mrf.mxu0  ;;  %v1193_v4 = vpop.f32.mrf.mxu1 }
 0x4d1   :  { %v1089_v57 = vpop.xlane.xlu2 %1088 }
 0x4d2   :  { %v1090_v56 = vmul.f32 %v1089_v57, %v1901_v1 }
 0x4d4   :  { %v2186_v34 = vsub.f32 %v1042_v37, %v1090_v56  ;;  %v2188_v6 = vsub.f32 %v1055_v5, %v1090_v56  ;;  %v2190_v38 = vsub.f32 %v1068_v9, %v1090_v56  ;;  %v2192_v59 = vsub.f32 %v1081_v36, %v1090_v56 }
 0x4d6   :  { %v1095_v55 = vmul.f32 %v2186_v34, %v2186_v34  ;;  %v1096_v50 = vmul.f32 %v2188_v6, %v2188_v6  ;;  %v1097_v14 = vmul.f32 %v2190_v38, %v2190_v38  ;;  %v1098_v15 = vmul.f32 %v2192_v59, %v2192_v59 }
 0x4d8   :  { %v1099_v31 = vadd.f32 %v1096_v50, %v1095_v55 }
 0x4da   :  { %v1100_v26 = vadd.f32 %v1099_v31, %v1097_v14 }
 0x4dc   :  { %v1101_v51 = vadd.f32 %v1100_v26, %v1098_v15 }
 0x4de   :  { %1102 = vadd.xlane.f32.xlu1 %v1101_v51 }
 0x4e2   :  { %v1225_v41 = vpop.xlane.xlu0 %1224 }
 0x4e3   :  { %v1226_v3 = vmul.f32 %v1225_v41, %v1901_v1 }
 0x4e5   :  { %v1227_v49 = vsub.f32 %v1178_v33, %v1226_v3  ;;  %v1228_v29 = vsub.f32 %v1191_v8, %v1226_v3  ;;  %v1229_v63 = vsub.f32 %v1204_v52, %v1226_v3  ;;  %v1230_v27 = vsub.f32 %v1217_v32, %v1226_v3 }
 0x4e7   :  { %v1231_v2 = vmul.f32 %v1227_v49, %v1227_v49  ;;  %v1232_v17 = vmul.f32 %v1228_v29, %v1228_v29  ;;  %v1233_v25 = vmul.f32 %v1229_v63, %v1229_v63  ;;  %v1234_v48 = vmul.f32 %v1230_v27, %v1230_v27 }
 0x4e9   :  { %v1235_v30 = vadd.f32 %v1232_v17, %v1231_v2 }
 0x4eb   :  { %v1236_v24 = vadd.f32 %v1235_v30, %v1233_v25 }
 0x4ed   :  { %v1237_v21 = vadd.f32 %v1236_v24, %v1234_v48 }
 0x4ef   :  { %1238 = vadd.xlane.f32.xlu2 %v1237_v21 }
 0x507   :  { %1130 = vperm.xlu2 %1334, %v1127_v60  }
 0x50f   :  { %1266 = vperm.xlu2 %1334, %v1263_v16  }
 0x551   :  { %v1103_v20 = vpop.xlane.xlu1 %1102 }
 0x552   :  { %v1104_v10 = vmul.f32 %v1103_v20, %v1901_v1 }
 0x554   :  { %v1106_v7 = vadd.f32 1e-05, %v1104_v10 }
 0x556   :  { %1339 = vrsqrt.f32 %v1106_v7  ;;  %vm1113_vm2 = vweird.f32 %v1106_v7 }
 0x55c   :  { %v1340_v62 = vpop.eup %1339 }
 0x55d   :  { %v1108_v45 = vmul.f32 %v1340_v62, %v1106_v7  ;;  %vm1114_vm0 = vweird.f32 %v1340_v62 }
 0x55e   :  { %vm1115_vm4 = vmor %vm1113_vm2, %vm1114_vm0 }
 0x55f   :  { %v1109_v44 = vmul.f32 %v1340_v62, %v1108_v45 }
 0x561   :  { %v1110_v58 = vmul.f32 0.5, %v1109_v44 }
 0x562   :  { %v1239_v61 = vpop.xlane.xlu2 %1238 }
 0x563   :  { %v1240_v39 = vmul.f32 %v1239_v61, %v1901_v1  ;;  %v1111_v40 = vsub.f32 1.5, %v1110_v58 }
 0x565   :  { %v1242_v12 = vadd.f32 1e-05, %v1240_v39  ;;  %v1112_v35 = vmul.f32 %v1340_v62, %v1111_v40 }
 0x567   :  { %1341 = vrsqrt.f32 %v1242_v12  ;;  %v1116_v9 = vsel %vm1115_vm4, %v1340_v62, %v1112_v35  ;;  %vm1249_vm6 = vweird.f32 %v1242_v12 }
 0x568   :  { %v1117_v36 = vmul.f32 %v1116_v9, %v1105_v46 }
 0x56a   :  { %1120 = vperm.xlu0 %1333, %v1117_v36   ;;  %v1131_v32 = vpop.permute.xlu2 %1130 }
 0x56d   :  { %v1342_v22 = vpop.eup %1341 }
 0x56e   :  { %v1244_v42 = vmul.f32 %v1342_v22, %v1242_v12  ;;  %vm1250_vm5 = vweird.f32 %v1342_v22 }
 0x56f   :  { %vm1251_vm7 = vmor %vm1249_vm6, %vm1250_vm5 }
 0x570   :  { %v1245_v37 = vmul.f32 %v1342_v22, %v1244_v42 }
 0x572   :  { %v1246_v5 = vmul.f32 0.5, %v1245_v37  ;;  %v1267_v50 = vpop.permute.xlu2 %1266 }
 0x574   :  { %v1247_v1 = vsub.f32 1.5, %v1246_v5 }
 0x576   :  { %v1248_v0 = vmul.f32 %v1342_v22, %v1247_v1 }
 0x578   :  { %v1252_v54 = vsel %vm1251_vm7, %v1342_v22, %v1248_v0 }
 0x579   :  { %v1253_v52 = vmul.f32 %v1252_v54, %v1241_v13 }
 0x57b   :  { %1256 = vperm.xlu1 %1332, %v1253_v52  }
 0x5dc   :  { %v1121_v43 = vpop.permute.xlu0 %1120 }
 0x5dd   :  { %v1123_v11 = vmul.f32 %v1121_v43, %v2186_v34  ;;  %v1124_v19 = vmul.f32 %v1121_v43, %v2188_v6  ;;  %v1125_v28 = vmul.f32 %v1121_v43, %v2190_v38  ;;  %v1126_v33 = vmul.f32 %v1121_v43, %v2192_v59 }
 0x5df   :  { %v1133_v4 = vadd.f32 %v1131_v32, %v1123_v11  ;;  %v1134_v57 = vadd.f32 %v1131_v32, %v1124_v19  ;;  %v1135_v56 = vadd.f32 %v1131_v32, %v1125_v28  ;;  %v1136_v55 = vadd.f32 %v1131_v32, %v1126_v33 }
 0x5ed   :  { %v1257_v8 = vpop.permute.xlu1 %1256 }
 0x5ee   :  { %v1259_v53 = vmul.f32 %v1257_v8, %v1227_v49  ;;  %v1260_v47 = vmul.f32 %v1257_v8, %v1228_v29  ;;  %v1261_v23 = vmul.f32 %v1257_v8, %v1229_v63  ;;  %v1262_v18 = vmul.f32 %v1257_v8, %v1230_v27 }
 0x5f0   :  { %v1269_v14 = vadd.f32 %v1267_v50, %v1259_v53  ;;  %v1270_v31 = vadd.f32 %v1267_v50, %v1260_v47  ;;  %v1271_v15 = vadd.f32 %v1267_v50, %v1261_v23  ;;  %v1272_v34 = vadd.f32 %v1267_v50, %v1262_v18 }
 0x5f2   :  { %v1273_v26 = vadd.f32 %v1269_v14, %v1133_v4  ;;  %v1274_v6 = vadd.f32 %v1270_v31, %v1134_v57  ;;  %v1275_v51 = vadd.f32 %v1271_v15, %v1135_v56  ;;  %v1276_v38 = vadd.f32 %v1272_v34, %v1136_v55 }
 0x5f4   :  { %v1277_v41 = vmax.f32 %v1273_v26, 0.0  ;;  %v1278_v59 = vmax.f32 %v1274_v6, 0.0  ;;  %v1279_v3 = vmax.f32 %v1275_v51, 0.0  ;;  %v1280_v49 = vmax.f32 %v1276_v38, 0.0 }
 0x5f6   :  { %1281 = vst [vmem:[#allocation2] sm:$0xff] %v1277_v41 }
 0x5f7   :  { %1282 = vst [vmem:[#allocation2 + $0x8] sm:$0xff] %v1278_v59 }
 0x5f8   :  { %1283 = vst [vmem:[#allocation2 + $0x10] sm:$0xff] %v1279_v3 }
 0x5f9   :  { %1284 = vst [vmem:[#allocation2 + $0x18] sm:$0xff] %v1280_v49 }
 0x5fa   :  { %1295 = dma.vmem_to_hbm [thread:$0]  %s1291_s9, 512, %s1293_s19, [#allocation3]  }
 0x5fb   :  { %1367 = dma.done.wait [#allocation3], 512  }
 0x5fc   :  { %1368 = vsyncadd [#allocation3], 4294966784 }
 0x5fd   :  { %1300 = vsyncpa [#allocation3], 1 }

</bundles_post_ra>
